<compile_context>
chip_gen: v5e
topology: v5e:2x2
jax: 0.10.0
libtpu: 0.0.40
codegen_flags: <defaults>
</compile_context>

<pallas_src>
import jax
import jax.numpy as jnp
from jax import lax
from jax.experimental import pallas as pl
from jax.experimental.pallas import tpu as pltpu


# ----------------------------- Pallas kernel --------------------------------

def music_lstm_kernel(z0p_ref,      # (T_TILE, B_TILE, 8H)  interleaved pre-acts
                      wrec_ref,     # (2H, 8H)  block-diag [w_hh0|w_ih1 ; 0|w_hh1]
                      b1d_ref,      # (1, 8H)   drain bias (b1 in layer-1 cols)
                      w_head_ref,   # (2H, OUT_PAD)  fused heads (h0 rows zero)
                      b_head_ref,   # (1, OUT_PAD)
                      out_ref,      # (B_TILE, OUT_PAD)
                      hh_ref,       # (B_TILE, 2H) scratch: [h0 | h1]
                      cc_ref):      # (B_TILE, 2H) scratch: [c0 | c1]
    t_idx = pl.program_id(1)
    t_tile = z0p_ref.shape[0]
    H2 = wrec_ref.shape[0]          # 2H

    # Reset the carried wavefront state at the start of each batch tile sweep.
    @pl.when(t_idx == 0)
    def _():
        hh_ref[...] = jnp.zeros_like(hh_ref)
        cc_ref[...] = jnp.zeros_like(cc_ref)

    wrec = wrec_ref[...]
    hh = hh_ref[...]
    cc = cc_ref[...]

    def step(z_in, hh, cc):
        # One block-diagonal matmul: cols [0:4H] -> layer-0 recurrent term for
        # step t, cols [4H:8H] -> layer-1 pre-activation for step t-1.
        zz = jnp.dot(hh, wrec, preferred_element_type=jnp.float32) + z_in
        s = jax.nn.sigmoid(zz)              # two full-width EUP passes
        th = jnp.tanh(zz)
        ii = s[:, 0:H2]
        ff = s[:, H2:2 * H2]
        gg = th[:, 2 * H2:3 * H2]
        oo = s[:, 3 * H2:4 * H2]
        cc_new = ff * cc + ii * gg          # updates [c0 | c1] in lane-place
        hh_new = oo * jnp.tanh(cc_new)      # updates [h0 | h1] in lane-place
        return hh_new, cc_new

    # TODO(synk): nn.LSTM dropout=0.3 applies only in training mode; this is
    # the eval-mode forward (no inter-layer dropout).
    def body(t, carry):
        hh, cc = carry
        return step(z0p_ref[t], hh, cc)

    hh, cc = lax.fori_loop(0, t_tile, body, (hh, cc), unroll=True)

    hh_ref[...] = hh
    cc_ref[...] = cc

    # Drain the wavefront (layer-1 of the final time step) and emit the fused,
    # lane-dense heads -- only on the last time chunk of this batch tile.
    @pl.when(t_idx == pl.num_programs(1) - 1)
    def _():
        hh_d, _ = step(b1d_ref[...], hh, cc)   # layer-0 half unused (head rows 0)
        out_ref[...] = (jnp.dot(hh_d, w_head_ref[...],
                                preferred_element_type=jnp.float32)
                        + b_head_ref[...])


# ------------------------------- wrapper -------------------------------------

def init_params(key, vocab, emb_dim, hidden, num_layers=2):
    assert num_layers == 2, "kernel is specialized for num_layers=2"
    input_size = emb_dim + 3
    ks = jax.random.split(key, 17)
    s = 1.0 / jnp.sqrt(hidden)

    def u(k, shape):
        return jax.random.uniform(k, shape, jnp.float32, -s, s)

    params = dict(
        embedding=jax.random.normal(ks[0], (vocab, emb_dim), jnp.float32),
        # layer 0 (weights stored transposed w.r.t. PyTorch: (in, 4H), gate
        # order [i, f, g, o])
        w_ih0=u(ks[1], (input_size, 4 * hidden)),
        w_hh0=u(ks[2], (hidden, 4 * hidden)),
        b0=u(ks[3], (1, 4 * hidden)) + u(ks[4], (1, 4 * hidden)),
        # layer 1
        w_ih1=u(ks[5], (hidden, 4 * hidden)),
        w_hh1=u(ks[6], (hidden, 4 * hidden)),
        b1=u(ks[7], (1, 4 * hidden)) + u(ks[8], (1, 4 * hidden)),
        # heads (transposed: (H, out))
        w_pitch=u(ks[9], (hidden, vocab)),
        b_pitch=u(ks[10], (1, vocab)),
        w_step=u(ks[11], (hidden, 1)),
        b_step=u(ks[12], (1, 1)),
        w_dur=u(ks[13], (hidden, 1)),
        b_dur=u(ks[14], (1, 1)),
        w_vel=u(ks[15], (hidden, 1)),
        b_vel=u(ks[16], (1, 1)),
    )
    return params


def _interleave_gates(l0, l1, H):
    """[i,f,g,o] columns of layer-0 / layer-1 -> [i0 i1 | f0 f1 | g0 g1 | o0 o1]."""
    parts = []
    for g in range(4):
        parts.append(l0[..., g * H:(g + 1) * H])
        parts.append(l1[..., g * H:(g + 1) * H])
    return jnp.concatenate(parts, axis=-1)


def music_lstm_forward(params, x_pitch, x_step, x_duration, x_velocity,
                       *, t_tile=None, b_tile=None):
    V, E = params["embedding"].shape
    H = params["w_hh0"].shape[0]
    B, T, _ = x_pitch.shape

    # --- XLA glue: embedding gather + concat + hoisted layer-0 projection -----
    emb = params["embedding"][x_pitch[..., 0]]                      # (B, T, E)
    x = jnp.concatenate([emb, x_step, x_duration, x_velocity],
                        axis=-1).astype(jnp.float32)                # (B, T, I)
    # One big matmul for the whole sequence; emit time-major directly.
    z0 = jnp.einsum('bti,ig->tbg', x, params["w_ih0"]) + params["b0"]   # (T,B,4H)

    # Interleave gate columns; layer-1 columns carry b1 (the bias of the
    # wavefront's lagging layer-1 step that is completed at the next step).
    b1 = params["b1"]                                               # (1, 4H)
    z0p = _interleave_gates(z0, jnp.broadcast_to(b1, (T, B, 4 * H)), H)  # (T,B,8H)
    # Neutralize the phantom layer-1 step at global t=0: zero its g-gate
    # pre-activation so c1 = h1 = 0 exactly after the first wavefront step.
    z0p = z0p.at[0, :, 5 * H:6 * H].set(0.0)

    # Block-diagonal recurrent weight: rows [0:H] = h0 -> (w_hh0 | w_ih1),
    # rows [H:2H] = h1 -> (0 | w_hh1); columns interleaved like z0p.
    wrec = jnp.concatenate([
        _interleave_gates(params["w_hh0"], params["w_ih1"], H),
        _interleave_gates(jnp.zeros((H, 4 * H), jnp.float32), params["w_hh1"], H),
    ], axis=0)                                                      # (2H, 8H)
    b1_drain = _interleave_gates(jnp.zeros((1, 4 * H), jnp.float32), b1, H)  # (1,8H)

    # Fused output heads, padded to 128 lanes; rows for the h0 half are zero so
    # the drained [h0_garbage | h1_last] can be fed directly.
    w_head = jnp.concatenate([params["w_pitch"], params["w_step"],
                              params["w_dur"], params["w_vel"]], axis=-1)   # (H, V+3)
    b_head = jnp.concatenate([params["b_pitch"], params["b_step"],
                              params["b_dur"], params["b_vel"]], axis=-1)   # (1, V+3)
    out_dim = V + 3
    out_pad = ((out_dim + 127) // 128) * 128
    w_head2 = jnp.zeros((2 * H, out_pad), jnp.float32).at[H:, :out_dim].set(w_head)
    b_head2 = jnp.zeros((1, out_pad), jnp.float32).at[:, :out_dim].set(b_head)

    # --- tiling: single invocation at small sizes (latency-bound RNN) ---------
    if b_tile is None:
        b_tile = B                       # no batch split on single-TC parts
    if t_tile is None:
        t_tile = T if T <= 64 else next(c for c in (64, 32, 16, 8, 4, 2, 1)
                                        if T % c == 0)
    assert B % b_tile == 0 and T % t_tile == 0
    assert b_tile % 8 == 0 or b_tile == B
    grid = (B // b_tile, T // t_tile)    # (parallel batch, arbitrary time)

    out = pl.pallas_call(
        music_lstm_kernel,
        out_shape=jax.ShapeDtypeStruct((B, out_pad), jnp.float32),
        grid_spec=pltpu.PrefetchScalarGridSpec(
            num_scalar_prefetch=0,
            grid=grid,
            in_specs=[
                pl.BlockSpec((t_tile, b_tile, 8 * H), lambda b, t: (t, b, 0)),
                pl.BlockSpec((2 * H, 8 * H), lambda b, t: (0, 0)),
                pl.BlockSpec((1, 8 * H), lambda b, t: (0, 0)),
                pl.BlockSpec((2 * H, out_pad), lambda b, t: (0, 0)),
                pl.BlockSpec((1, out_pad), lambda b, t: (0, 0)),
            ],
            out_specs=pl.BlockSpec((b_tile, out_pad), lambda b, t: (b, 0)),
            scratch_shapes=[pltpu.VMEM((b_tile, 2 * H), jnp.float32)] * 2,
        ),
        compiler_params=pltpu.CompilerParams(
            dimension_semantics=("parallel", "arbitrary")),
    )(z0p, wrec, b1_drain, w_head2, b_head2)

    pitch = out[:, :V]
    step = out[:, V:V + 1]
    duration = out[:, V + 1:V + 2]
    velocity = out[:, V + 2:V + 3]
    return pitch, step, duration, velocity


# ------------------------- pure-JAX reference (check) ------------------------

def reference_forward(params, x_pitch, x_step, x_duration, x_velocity):
    H = params["w_hh0"].shape[0]
    emb = params["embedding"][x_pitch[..., 0]]
    x = jnp.concatenate([emb, x_step, x_duration, x_velocity],
                        axis=-1).astype(jnp.float32)
    B, T, _ = x.shape

    def cell(x_t, h, c, w_ih, w_hh, b):
        z = x_t @ w_ih + h @ w_hh + b
        i = jax.nn.sigmoid(z[:, 0 * H:1 * H])
        f = jax.nn.sigmoid(z[:, 1 * H:2 * H])
        g = jnp.tanh(z[:, 2 * H:3 * H])
        o = jax.nn.sigmoid(z[:, 3 * H:4 * H])
        c = f * c + i * g
        h = o * jnp.tanh(c)
        return h, c

    h0 = c0 = h1 = c1 = jnp.zeros((B, H), jnp.float32)
    for t in range(T):
        h0, c0 = cell(x[:, t, :], h0, c0,
                      params["w_ih0"], params["w_hh0"], params["b0"])
        h1, c1 = cell(h0, h1, c1,
                      params["w_ih1"], params["w_hh1"], params["b1"])
    pitch = h1 @ params["w_pitch"] + params["b_pitch"]
    step = h1 @ params["w_step"] + params["b_step"]
    duration = h1 @ params["w_dur"] + params["b_dur"]
    velocity = h1 @ params["w_vel"] + params["b_vel"]
    return pitch, step, duration, velocity


# --------------------------------- main ---------------------------------------

if __name__ == "__main__":
    VOCAB = 32        # pitch_vocab_size
    EMB = 13          # embedding_dim  -> LSTM input size = 16
    HIDDEN = 32       # hidden_size
    B, T = 16, 8      # batch, sequence length

    key = jax.random.PRNGKey(0)
    k_param, k_p, k_s, k_d, k_v = jax.random.split(key, 5)

    params = init_params(k_param, VOCAB, EMB, HIDDEN, num_layers=2)

    x_pitch = jax.random.randint(k_p, (B, T, 1), 0, VOCAB, dtype=jnp.int32)
    x_step = jax.random.uniform(k_s, (B, T, 1), jnp.float32)
    x_duration = jax.random.uniform(k_d, (B, T, 1), jnp.float32)
    x_velocity = jax.random.uniform(k_v, (B, T, 1), jnp.float32)

    refs = reference_forward(params, x_pitch, x_step, x_duration, x_velocity)

    # Default config per the perf review: single grid invocation (b_tile=B,
    # t_tile=T) -- the whole recurrence in one kernel call.
    outs = music_lstm_forward(params, x_pitch, x_step, x_duration, x_velocity)
    outs = jax.block_until_ready(outs)
    for o, r in zip(outs, refs):
        assert o.shape == r.shape, (o.shape, r.shape)
        assert float(jnp.max(jnp.abs(o - r))) < 1e-4

    # Extra verification of the carried-state / chunked path (batch tiles +
    # time chunks) used for scaled-up B / T.
    outs2 = music_lstm_forward(params, x_pitch, x_step, x_duration, x_velocity,
                               t_tile=4, b_tile=8)
    outs2 = jax.block_until_ready(outs2)
    for o, r in zip(outs2, refs):
        assert float(jnp.max(jnp.abs(o - r))) < 1e-4

    print("KERNEL_OK")
</pallas_src>

<mosaic_0001>
module attributes {stable_mosaic.version = 11 : i64} {
  func.func @music_lstm_kernel(%arg0: i32, %arg1: i32, %arg2: memref<8x16x256xf32, #tpu.memory_space<vmem>>, %arg3: memref<64x256xf32, #tpu.memory_space<vmem>>, %arg4: memref<1x256xf32, #tpu.memory_space<vmem>>, %arg5: memref<64x128xf32, #tpu.memory_space<vmem>>, %arg6: memref<1x128xf32, #tpu.memory_space<vmem>>, %arg7: memref<16x128xf32, #tpu.memory_space<vmem>>, %arg8: memref<16x64xf32, #tpu.memory_space<vmem>>, %arg9: memref<16x64xf32, #tpu.memory_space<vmem>>) attributes {dimension_semantics = [#tpu.dimension_semantics<parallel>, #tpu.dimension_semantics<arbitrary>], iteration_bounds = array<i64: 1, 1>, scalar_prefetch = 0 : i64, scratch_operands = 2 : i64, tpu.core_type = #tpu.core_type<tc>, window_params = [{transform_indices = @transform_0, window_bounds = array<i64: 8, 16, 256>}, {pipeline_mode = #tpu.pipeline_mode<synchronous>, transform_indices = @transform_1, window_bounds = array<i64: 64, 256>}, {pipeline_mode = #tpu.pipeline_mode<synchronous>, transform_indices = @transform_2, window_bounds = array<i64: 1, 256>}, {pipeline_mode = #tpu.pipeline_mode<synchronous>, transform_indices = @transform_3, window_bounds = array<i64: 64, 128>}, {pipeline_mode = #tpu.pipeline_mode<synchronous>, transform_indices = @transform_4, window_bounds = array<i64: 1, 128>}, {transform_indices = @transform_5, window_bounds = array<i64: 16, 128>}]} {
    %c0_i32 = arith.constant 0 : i32
    %0 = arith.cmpi eq, %arg1, %c0_i32 : i32
    %1 = arith.extui %0 : i1 to i32
    %c0_i32_0 = arith.constant 0 : i32
    %2 = arith.cmpi ne, %1, %c0_i32_0 : i32
    scf.if %2 {
      %cst_44 = arith.constant 0.000000e+00 : f32
      %171 = vector.broadcast %cst_44 : f32 to vector<16x64xf32>
      %c0_45 = arith.constant 0 : index
      %c0_46 = arith.constant 0 : index
      %172 = vector.load %arg8[%c0_45, %c0_46] : memref<16x64xf32, #tpu.memory_space<vmem>>, vector<16x64xf32>
      tpu.vector_store %arg8[%c0_45, %c0_46], %171 {strides = array<i32>} : memref<16x64xf32, #tpu.memory_space<vmem>>, vector<16x64xf32>,
      %cst_47 = arith.constant 0.000000e+00 : f32
      %173 = vector.broadcast %cst_47 : f32 to vector<16x64xf32>
      %c0_48 = arith.constant 0 : index
      %c0_49 = arith.constant 0 : index
      %174 = vector.load %arg9[%c0_48, %c0_49] : memref<16x64xf32, #tpu.memory_space<vmem>>, vector<16x64xf32>
      tpu.vector_store %arg9[%c0_48, %c0_49], %173 {strides = array<i32>} : memref<16x64xf32, #tpu.memory_space<vmem>>, vector<16x64xf32>,
    } else {
    }
    %c0 = arith.constant 0 : index
    %c0_1 = arith.constant 0 : index
    %3 = vector.load %arg3[%c0, %c0_1] : memref<64x256xf32, #tpu.memory_space<vmem>>, vector<64x256xf32>
    %c0_2 = arith.constant 0 : index
    %c0_3 = arith.constant 0 : index
    %4 = vector.load %arg8[%c0_2, %c0_3] : memref<16x64xf32, #tpu.memory_space<vmem>>, vector<16x64xf32>
    %c0_4 = arith.constant 0 : index
    %c0_5 = arith.constant 0 : index
    %5 = vector.load %arg9[%c0_4, %c0_5] : memref<16x64xf32, #tpu.memory_space<vmem>>, vector<16x64xf32>
    %c0_i32_6 = arith.constant 0 : i32
    %6 = arith.index_cast %c0_i32_6 : i32 to index
    %c0_7 = arith.constant 0 : index
    %c0_8 = arith.constant 0 : index
    %7 = vector.load %arg2[%6, %c0_7, %c0_8] : memref<8x16x256xf32, #tpu.memory_space<vmem>>, vector<1x16x256xf32>
    %8 = vector.shape_cast %7 : vector<1x16x256xf32> to vector<16x256xf32>
    %cst = arith.constant dense<0.000000e+00> : vector<16x256xf32>
    %9 = tpu.matmul %4, %3, %cst {dimension_numbers = #tpu.dot_dimension_numbers<[1], [0], [0], [1], [0, 0, 1, 1], [], []>} : vector<16x64xf32>, vector<64x256xf32>, vector<16x256xf32> -> vector<16x256xf32>
    %10 = arith.addf %9, %8 : vector<16x256xf32>
    %11 = arith.negf %10 : vector<16x256xf32>
    %12 = math.exp %11 : vector<16x256xf32>
    %cst_9 = arith.constant 1.000000e+00 : f32
    %13 = vector.broadcast %cst_9 : f32 to vector<16x256xf32>
    %14 = arith.addf %13, %12 : vector<16x256xf32>
    %15 = arith.divf %13, %14 : vector<16x256xf32>
    %16 = math.tanh %10 : vector<16x256xf32>
    %17 = vector.extract_strided_slice %15 {offsets = [0, 0], sizes = [16, 64], strides = [1, 1]} : vector<16x256xf32> to vector<16x64xf32>
    %18 = vector.extract_strided_slice %15 {offsets = [0, 64], sizes = [16, 64], strides = [1, 1]} : vector<16x256xf32> to vector<16x64xf32>
    %19 = vector.extract_strided_slice %16 {offsets = [0, 128], sizes = [16, 64], strides = [1, 1]} : vector<16x256xf32> to vector<16x64xf32>
    %20 = vector.extract_strided_slice %15 {offsets = [0, 192], sizes = [16, 64], strides = [1, 1]} : vector<16x256xf32> to vector<16x64xf32>
    %21 = arith.mulf %18, %5 : vector<16x64xf32>
    %22 = arith.mulf %17, %19 : vector<16x64xf32>
    %23 = arith.addf %21, %22 : vector<16x64xf32>
    %24 = math.tanh %23 : vector<16x64xf32>
    %25 = arith.mulf %20, %24 : vector<16x64xf32>
    %c1_i32 = arith.constant 1 : i32
    %26 = arith.index_cast %c1_i32 : i32 to index
    %c0_10 = arith.constant 0 : index
    %c0_11 = arith.constant 0 : index
    %27 = vector.load %arg2[%26, %c0_10, %c0_11] : memref<8x16x256xf32, #tpu.memory_space<vmem>>, vector<1x16x256xf32>
    %28 = vector.shape_cast %27 : vector<1x16x256xf32> to vector<16x256xf32>
    %cst_12 = arith.constant dense<0.000000e+00> : vector<16x256xf32>
    %29 = tpu.matmul %25, %3, %cst_12 {dimension_numbers = #tpu.dot_dimension_numbers<[1], [0], [0], [1], [0, 0, 1, 1], [], []>} : vector<16x64xf32>, vector<64x256xf32>, vector<16x256xf32> -> vector<16x256xf32>
    %30 = arith.addf %29, %28 : vector<16x256xf32>
    %31 = arith.negf %30 : vector<16x256xf32>
    %32 = math.exp %31 : vector<16x256xf32>
    %cst_13 = arith.constant 1.000000e+00 : f32
    %33 = vector.broadcast %cst_13 : f32 to vector<16x256xf32>
    %34 = arith.addf %33, %32 : vector<16x256xf32>
    %35 = arith.divf %33, %34 : vector<16x256xf32>
    %36 = math.tanh %30 : vector<16x256xf32>
    %37 = vector.extract_strided_slice %35 {offsets = [0, 0], sizes = [16, 64], strides = [1, 1]} : vector<16x256xf32> to vector<16x64xf32>
    %38 = vector.extract_strided_slice %35 {offsets = [0, 64], sizes = [16, 64], strides = [1, 1]} : vector<16x256xf32> to vector<16x64xf32>
    %39 = vector.extract_strided_slice %36 {offsets = [0, 128], sizes = [16, 64], strides = [1, 1]} : vector<16x256xf32> to vector<16x64xf32>
    %40 = vector.extract_strided_slice %35 {offsets = [0, 192], sizes = [16, 64], strides = [1, 1]} : vector<16x256xf32> to vector<16x64xf32>
    %41 = arith.mulf %38, %23 : vector<16x64xf32>
    %42 = arith.mulf %37, %39 : vector<16x64xf32>
    %43 = arith.addf %41, %42 : vector<16x64xf32>
    %44 = math.tanh %43 : vector<16x64xf32>
    %45 = arith.mulf %40, %44 : vector<16x64xf32>
    %c2_i32 = arith.constant 2 : i32
    %46 = arith.index_cast %c2_i32 : i32 to index
    %c0_14 = arith.constant 0 : index
    %c0_15 = arith.constant 0 : index
    %47 = vector.load %arg2[%46, %c0_14, %c0_15] : memref<8x16x256xf32, #tpu.memory_space<vmem>>, vector<1x16x256xf32>
    %48 = vector.shape_cast %47 : vector<1x16x256xf32> to vector<16x256xf32>
    %cst_16 = arith.constant dense<0.000000e+00> : vector<16x256xf32>
    %49 = tpu.matmul %45, %3, %cst_16 {dimension_numbers = #tpu.dot_dimension_numbers<[1], [0], [0], [1], [0, 0, 1, 1], [], []>} : vector<16x64xf32>, vector<64x256xf32>, vector<16x256xf32> -> vector<16x256xf32>
    %50 = arith.addf %49, %48 : vector<16x256xf32>
    %51 = arith.negf %50 : vector<16x256xf32>
    %52 = math.exp %51 : vector<16x256xf32>
    %cst_17 = arith.constant 1.000000e+00 : f32
    %53 = vector.broadcast %cst_17 : f32 to vector<16x256xf32>
    %54 = arith.addf %53, %52 : vector<16x256xf32>
    %55 = arith.divf %53, %54 : vector<16x256xf32>
    %56 = math.tanh %50 : vector<16x256xf32>
    %57 = vector.extract_strided_slice %55 {offsets = [0, 0], sizes = [16, 64], strides = [1, 1]} : vector<16x256xf32> to vector<16x64xf32>
    %58 = vector.extract_strided_slice %55 {offsets = [0, 64], sizes = [16, 64], strides = [1, 1]} : vector<16x256xf32> to vector<16x64xf32>
    %59 = vector.extract_strided_slice %56 {offsets = [0, 128], sizes = [16, 64], strides = [1, 1]} : vector<16x256xf32> to vector<16x64xf32>
    %60 = vector.extract_strided_slice %55 {offsets = [0, 192], sizes = [16, 64], strides = [1, 1]} : vector<16x256xf32> to vector<16x64xf32>
    %61 = arith.mulf %58, %43 : vector<16x64xf32>
    %62 = arith.mulf %57, %59 : vector<16x64xf32>
    %63 = arith.addf %61, %62 : vector<16x64xf32>
    %64 = math.tanh %63 : vector<16x64xf32>
    %65 = arith.mulf %60, %64 : vector<16x64xf32>
    %c3_i32 = arith.constant 3 : i32
    %66 = arith.index_cast %c3_i32 : i32 to index
    %c0_18 = arith.constant 0 : index
    %c0_19 = arith.constant 0 : index
    %67 = vector.load %arg2[%66, %c0_18, %c0_19] : memref<8x16x256xf32, #tpu.memory_space<vmem>>, vector<1x16x256xf32>
    %68 = vector.shape_cast %67 : vector<1x16x256xf32> to vector<16x256xf32>
    %cst_20 = arith.constant dense<0.000000e+00> : vector<16x256xf32>
    %69 = tpu.matmul %65, %3, %cst_20 {dimension_numbers = #tpu.dot_dimension_numbers<[1], [0], [0], [1], [0, 0, 1, 1], [], []>} : vector<16x64xf32>, vector<64x256xf32>, vector<16x256xf32> -> vector<16x256xf32>
    %70 = arith.addf %69, %68 : vector<16x256xf32>
    %71 = arith.negf %70 : vector<16x256xf32>
    %72 = math.exp %71 : vector<16x256xf32>
    %cst_21 = arith.constant 1.000000e+00 : f32
    %73 = vector.broadcast %cst_21 : f32 to vector<16x256xf32>
    %74 = arith.addf %73, %72 : vector<16x256xf32>
    %75 = arith.divf %73, %74 : vector<16x256xf32>
    %76 = math.tanh %70 : vector<16x256xf32>
    %77 = vector.extract_strided_slice %75 {offsets = [0, 0], sizes = [16, 64], strides = [1, 1]} : vector<16x256xf32> to vector<16x64xf32>
    %78 = vector.extract_strided_slice %75 {offsets = [0, 64], sizes = [16, 64], strides = [1, 1]} : vector<16x256xf32> to vector<16x64xf32>
    %79 = vector.extract_strided_slice %76 {offsets = [0, 128], sizes = [16, 64], strides = [1, 1]} : vector<16x256xf32> to vector<16x64xf32>
    %80 = vector.extract_strided_slice %75 {offsets = [0, 192], sizes = [16, 64], strides = [1, 1]} : vector<16x256xf32> to vector<16x64xf32>
    %81 = arith.mulf %78, %63 : vector<16x64xf32>
    %82 = arith.mulf %77, %79 : vector<16x64xf32>
    %83 = arith.addf %81, %82 : vector<16x64xf32>
    %84 = math.tanh %83 : vector<16x64xf32>
    %85 = arith.mulf %80, %84 : vector<16x64xf32>
    %c4_i32 = arith.constant 4 : i32
    %86 = arith.index_cast %c4_i32 : i32 to index
    %c0_22 = arith.constant 0 : index
    %c0_23 = arith.constant 0 : index
    %87 = vector.load %arg2[%86, %c0_22, %c0_23] : memref<8x16x256xf32, #tpu.memory_space<vmem>>, vector<1x16x256xf32>
    %88 = vector.shape_cast %87 : vector<1x16x256xf32> to vector<16x256xf32>
    %cst_24 = arith.constant dense<0.000000e+00> : vector<16x256xf32>
    %89 = tpu.matmul %85, %3, %cst_24 {dimension_numbers = #tpu.dot_dimension_numbers<[1], [0], [0], [1], [0, 0, 1, 1], [], []>} : vector<16x64xf32>, vector<64x256xf32>, vector<16x256xf32> -> vector<16x256xf32>
    %90 = arith.addf %89, %88 : vector<16x256xf32>
    %91 = arith.negf %90 : vector<16x256xf32>
    %92 = math.exp %91 : vector<16x256xf32>
    %cst_25 = arith.constant 1.000000e+00 : f32
    %93 = vector.broadcast %cst_25 : f32 to vector<16x256xf32>
    %94 = arith.addf %93, %92 : vector<16x256xf32>
    %95 = arith.divf %93, %94 : vector<16x256xf32>
    %96 = math.tanh %90 : vector<16x256xf32>
    %97 = vector.extract_strided_slice %95 {offsets = [0, 0], sizes = [16, 64], strides = [1, 1]} : vector<16x256xf32> to vector<16x64xf32>
    %98 = vector.extract_strided_slice %95 {offsets = [0, 64], sizes = [16, 64], strides = [1, 1]} : vector<16x256xf32> to vector<16x64xf32>
    %99 = vector.extract_strided_slice %96 {offsets = [0, 128], sizes = [16, 64], strides = [1, 1]} : vector<16x256xf32> to vector<16x64xf32>
    %100 = vector.extract_strided_slice %95 {offsets = [0, 192], sizes = [16, 64], strides = [1, 1]} : vector<16x256xf32> to vector<16x64xf32>
    %101 = arith.mulf %98, %83 : vector<16x64xf32>
    %102 = arith.mulf %97, %99 : vector<16x64xf32>
    %103 = arith.addf %101, %102 : vector<16x64xf32>
    %104 = math.tanh %103 : vector<16x64xf32>
    %105 = arith.mulf %100, %104 : vector<16x64xf32>
    %c5_i32 = arith.constant 5 : i32
    %106 = arith.index_cast %c5_i32 : i32 to index
    %c0_26 = arith.constant 0 : index
    %c0_27 = arith.constant 0 : index
    %107 = vector.load %arg2[%106, %c0_26, %c0_27] : memref<8x16x256xf32, #tpu.memory_space<vmem>>, vector<1x16x256xf32>
    %108 = vector.shape_cast %107 : vector<1x16x256xf32> to vector<16x256xf32>
    %cst_28 = arith.constant dense<0.000000e+00> : vector<16x256xf32>
    %109 = tpu.matmul %105, %3, %cst_28 {dimension_numbers = #tpu.dot_dimension_numbers<[1], [0], [0], [1], [0, 0, 1, 1], [], []>} : vector<16x64xf32>, vector<64x256xf32>, vector<16x256xf32> -> vector<16x256xf32>
    %110 = arith.addf %109, %108 : vector<16x256xf32>
    %111 = arith.negf %110 : vector<16x256xf32>
    %112 = math.exp %111 : vector<16x256xf32>
    %cst_29 = arith.constant 1.000000e+00 : f32
    %113 = vector.broadcast %cst_29 : f32 to vector<16x256xf32>
    %114 = arith.addf %113, %112 : vector<16x256xf32>
    %115 = arith.divf %113, %114 : vector<16x256xf32>
    %116 = math.tanh %110 : vector<16x256xf32>
    %117 = vector.extract_strided_slice %115 {offsets = [0, 0], sizes = [16, 64], strides = [1, 1]} : vector<16x256xf32> to vector<16x64xf32>
    %118 = vector.extract_strided_slice %115 {offsets = [0, 64], sizes = [16, 64], strides = [1, 1]} : vector<16x256xf32> to vector<16x64xf32>
    %119 = vector.extract_strided_slice %116 {offsets = [0, 128], sizes = [16, 64], strides = [1, 1]} : vector<16x256xf32> to vector<16x64xf32>
    %120 = vector.extract_strided_slice %115 {offsets = [0, 192], sizes = [16, 64], strides = [1, 1]} : vector<16x256xf32> to vector<16x64xf32>
    %121 = arith.mulf %118, %103 : vector<16x64xf32>
    %122 = arith.mulf %117, %119 : vector<16x64xf32>
    %123 = arith.addf %121, %122 : vector<16x64xf32>
    %124 = math.tanh %123 : vector<16x64xf32>
    %125 = arith.mulf %120, %124 : vector<16x64xf32>
    %c6_i32 = arith.constant 6 : i32
    %126 = arith.index_cast %c6_i32 : i32 to index
    %c0_30 = arith.constant 0 : index
    %c0_31 = arith.constant 0 : index
    %127 = vector.load %arg2[%126, %c0_30, %c0_31] : memref<8x16x256xf32, #tpu.memory_space<vmem>>, vector<1x16x256xf32>
    %128 = vector.shape_cast %127 : vector<1x16x256xf32> to vector<16x256xf32>
    %cst_32 = arith.constant dense<0.000000e+00> : vector<16x256xf32>
    %129 = tpu.matmul %125, %3, %cst_32 {dimension_numbers = #tpu.dot_dimension_numbers<[1], [0], [0], [1], [0, 0, 1, 1], [], []>} : vector<16x64xf32>, vector<64x256xf32>, vector<16x256xf32> -> vector<16x256xf32>
    %130 = arith.addf %129, %128 : vector<16x256xf32>
    %131 = arith.negf %130 : vector<16x256xf32>
    %132 = math.exp %131 : vector<16x256xf32>
    %cst_33 = arith.constant 1.000000e+00 : f32
    %133 = vector.broadcast %cst_33 : f32 to vector<16x256xf32>
    %134 = arith.addf %133, %132 : vector<16x256xf32>
    %135 = arith.divf %133, %134 : vector<16x256xf32>
    %136 = math.tanh %130 : vector<16x256xf32>
    %137 = vector.extract_strided_slice %135 {offsets = [0, 0], sizes = [16, 64], strides = [1, 1]} : vector<16x256xf32> to vector<16x64xf32>
    %138 = vector.extract_strided_slice %135 {offsets = [0, 64], sizes = [16, 64], strides = [1, 1]} : vector<16x256xf32> to vector<16x64xf32>
    %139 = vector.extract_strided_slice %136 {offsets = [0, 128], sizes = [16, 64], strides = [1, 1]} : vector<16x256xf32> to vector<16x64xf32>
    %140 = vector.extract_strided_slice %135 {offsets = [0, 192], sizes = [16, 64], strides = [1, 1]} : vector<16x256xf32> to vector<16x64xf32>
    %141 = arith.mulf %138, %123 : vector<16x64xf32>
    %142 = arith.mulf %137, %139 : vector<16x64xf32>
    %143 = arith.addf %141, %142 : vector<16x64xf32>
    %144 = math.tanh %143 : vector<16x64xf32>
    %145 = arith.mulf %140, %144 : vector<16x64xf32>
    %c7_i32 = arith.constant 7 : i32
    %146 = arith.index_cast %c7_i32 : i32 to index
    %c0_34 = arith.constant 0 : index
    %c0_35 = arith.constant 0 : index
    %147 = vector.load %arg2[%146, %c0_34, %c0_35] : memref<8x16x256xf32, #tpu.memory_space<vmem>>, vector<1x16x256xf32>
    %148 = vector.shape_cast %147 : vector<1x16x256xf32> to vector<16x256xf32>
    %cst_36 = arith.constant dense<0.000000e+00> : vector<16x256xf32>
    %149 = tpu.matmul %145, %3, %cst_36 {dimension_numbers = #tpu.dot_dimension_numbers<[1], [0], [0], [1], [0, 0, 1, 1], [], []>} : vector<16x64xf32>, vector<64x256xf32>, vector<16x256xf32> -> vector<16x256xf32>
    %150 = arith.addf %149, %148 : vector<16x256xf32>
    %151 = arith.negf %150 : vector<16x256xf32>
    %152 = math.exp %151 : vector<16x256xf32>
    %cst_37 = arith.constant 1.000000e+00 : f32
    %153 = vector.broadcast %cst_37 : f32 to vector<16x256xf32>
    %154 = arith.addf %153, %152 : vector<16x256xf32>
    %155 = arith.divf %153, %154 : vector<16x256xf32>
    %156 = math.tanh %150 : vector<16x256xf32>
    %157 = vector.extract_strided_slice %155 {offsets = [0, 0], sizes = [16, 64], strides = [1, 1]} : vector<16x256xf32> to vector<16x64xf32>
    %158 = vector.extract_strided_slice %155 {offsets = [0, 64], sizes = [16, 64], strides = [1, 1]} : vector<16x256xf32> to vector<16x64xf32>
    %159 = vector.extract_strided_slice %156 {offsets = [0, 128], sizes = [16, 64], strides = [1, 1]} : vector<16x256xf32> to vector<16x64xf32>
    %160 = vector.extract_strided_slice %155 {offsets = [0, 192], sizes = [16, 64], strides = [1, 1]} : vector<16x256xf32> to vector<16x64xf32>
    %161 = arith.mulf %158, %143 : vector<16x64xf32>
    %162 = arith.mulf %157, %159 : vector<16x64xf32>
    %163 = arith.addf %161, %162 : vector<16x64xf32>
    %164 = math.tanh %163 : vector<16x64xf32>
    %165 = arith.mulf %160, %164 : vector<16x64xf32>
    %c8_i32 = arith.constant 8 : i32
    %c0_38 = arith.constant 0 : index
    %c0_39 = arith.constant 0 : index
    %166 = vector.load %arg8[%c0_38, %c0_39] : memref<16x64xf32, #tpu.memory_space<vmem>>, vector<16x64xf32>
    tpu.vector_store %arg8[%c0_38, %c0_39], %165 {strides = array<i32>} : memref<16x64xf32, #tpu.memory_space<vmem>>, vector<16x64xf32>,
    %c0_40 = arith.constant 0 : index
    %c0_41 = arith.constant 0 : index
    %167 = vector.load %arg9[%c0_40, %c0_41] : memref<16x64xf32, #tpu.memory_space<vmem>>, vector<16x64xf32>
    tpu.vector_store %arg9[%c0_40, %c0_41], %163 {strides = array<i32>} : memref<16x64xf32, #tpu.memory_space<vmem>>, vector<16x64xf32>,
    %c0_i32_42 = arith.constant 0 : i32
    %168 = arith.cmpi eq, %arg1, %c0_i32_42 : i32
    %169 = arith.extui %168 : i1 to i32
    %c0_i32_43 = arith.constant 0 : i32
    %170 = arith.cmpi ne, %169, %c0_i32_43 : i32
    scf.if %170 {
      %c0_44 = arith.constant 0 : index
      %c0_45 = arith.constant 0 : index
      %171 = vector.load %arg4[%c0_44, %c0_45] : memref<1x256xf32, #tpu.memory_space<vmem>>, vector<1x256xf32>
      %cst_46 = arith.constant dense<0.000000e+00> : vector<16x256xf32>
      %172 = tpu.matmul %165, %3, %cst_46 {dimension_numbers = #tpu.dot_dimension_numbers<[1], [0], [0], [1], [0, 0, 1, 1], [], []>} : vector<16x64xf32>, vector<64x256xf32>, vector<16x256xf32> -> vector<16x256xf32>
      %173 = vector.broadcast %171 : vector<1x256xf32> to vector<16x256xf32>
      %174 = arith.addf %172, %173 : vector<16x256xf32>
      %175 = arith.negf %174 : vector<16x256xf32>
      %176 = math.exp %175 : vector<16x256xf32>
      %cst_47 = arith.constant 1.000000e+00 : f32
      %177 = vector.broadcast %cst_47 : f32 to vector<16x256xf32>
      %178 = arith.addf %177, %176 : vector<16x256xf32>
      %179 = arith.divf %177, %178 : vector<16x256xf32>
      %180 = math.tanh %174 : vector<16x256xf32>
      %181 = vector.extract_strided_slice %179 {offsets = [0, 0], sizes = [16, 64], strides = [1, 1]} : vector<16x256xf32> to vector<16x64xf32>
      %182 = vector.extract_strided_slice %179 {offsets = [0, 64], sizes = [16, 64], strides = [1, 1]} : vector<16x256xf32> to vector<16x64xf32>
      %183 = vector.extract_strided_slice %180 {offsets = [0, 128], sizes = [16, 64], strides = [1, 1]} : vector<16x256xf32> to vector<16x64xf32>
      %184 = vector.extract_strided_slice %179 {offsets = [0, 192], sizes = [16, 64], strides = [1, 1]} : vector<16x256xf32> to vector<16x64xf32>
      %185 = arith.mulf %182, %163 : vector<16x64xf32>
      %186 = arith.mulf %181, %183 : vector<16x64xf32>
      %187 = arith.addf %185, %186 : vector<16x64xf32>
      %188 = math.tanh %187 : vector<16x64xf32>
      %189 = arith.mulf %184, %188 : vector<16x64xf32>
      %c0_48 = arith.constant 0 : index
      %c0_49 = arith.constant 0 : index
      %190 = vector.load %arg5[%c0_48, %c0_49] : memref<64x128xf32, #tpu.memory_space<vmem>>, vector<64x128xf32>
      %cst_50 = arith.constant dense<0.000000e+00> : vector<16x128xf32>
      %191 = tpu.matmul %189, %190, %cst_50 {dimension_numbers = #tpu.dot_dimension_numbers<[1], [0], [0], [1], [0, 0, 1, 1], [], []>} : vector<16x64xf32>, vector<64x128xf32>, vector<16x128xf32> -> vector<16x128xf32>
      %c0_51 = arith.constant 0 : index
      %c0_52 = arith.constant 0 : index
      %192 = vector.load %arg6[%c0_51, %c0_52] : memref<1x128xf32, #tpu.memory_space<vmem>>, vector<1x128xf32>
      %193 = vector.broadcast %192 : vector<1x128xf32> to vector<16x128xf32>
      %194 = arith.addf %191, %193 : vector<16x128xf32>
      %c0_53 = arith.constant 0 : index
      %c0_54 = arith.constant 0 : index
      %195 = vector.load %arg7[%c0_53, %c0_54] : memref<16x128xf32, #tpu.memory_space<vmem>>, vector<16x128xf32>
      tpu.vector_store %arg7[%c0_53, %c0_54], %194 {strides = array<i32>} : memref<16x128xf32, #tpu.memory_space<vmem>>, vector<16x128xf32>,
    } else {
    }
    return
  }
  func.func @transform_0(%arg0: i32, %arg1: i32) -> (i32, i32, i32) {
    %c0_i32 = arith.constant 0 : i32
    %c0_i32_0 = arith.constant 0 : i32
    return %arg1, %arg0, %c0_i32 : i32, i32, i32
  }
  func.func @transform_1(%arg0: i32, %arg1: i32) -> (i32, i32) {
    %c0_i32 = arith.constant 0 : i32
    %c0_i32_0 = arith.constant 0 : i32
    %c0_i32_1 = arith.constant 0 : i32
    return %c0_i32, %c0_i32_0 : i32, i32
  }
  func.func @transform_2(%arg0: i32, %arg1: i32) -> (i32, i32) {
    %c0_i32 = arith.constant 0 : i32
    %c0_i32_0 = arith.constant 0 : i32
    %c0_i32_1 = arith.constant 0 : i32
    return %c0_i32, %c0_i32_0 : i32, i32
  }
  func.func @transform_3(%arg0: i32, %arg1: i32) -> (i32, i32) {
    %c0_i32 = arith.constant 0 : i32
    %c0_i32_0 = arith.constant 0 : i32
    %c0_i32_1 = arith.constant 0 : i32
    return %c0_i32, %c0_i32_0 : i32, i32
  }
  func.func @transform_4(%arg0: i32, %arg1: i32) -> (i32, i32) {
    %c0_i32 = arith.constant 0 : i32
    %c0_i32_0 = arith.constant 0 : i32
    %c0_i32_1 = arith.constant 0 : i32
    return %c0_i32, %c0_i32_0 : i32, i32
  }
  func.func @transform_5(%arg0: i32, %arg1: i32) -> (i32, i32) {
    %c0_i32 = arith.constant 0 : i32
    %c0_i32_0 = arith.constant 0 : i32
    return %arg0, %c0_i32 : i32, i32
  }
}

</mosaic_0001>

<bundles_post_ra>
// kernel: tpu_custom_call.1
= control target key start
LH: loop header
LB: loop body
LE: loop exit
PB: predicated region body
PF: predicated region fallthrough
CT: control target
= control target key end

     0   :  { %10 = vsyncpa [#allocation5], 0  ;;  %s2477_s0 = inlined_call_operand.hbm [shape: f32[8,16,256], index: 0, kind: input, shape index: {}]   ;;  %s2478_s1 = inlined_call_operand.hbm [shape: f32[64,256], index: 1, kind: input, shape index: {}]   ;;  %s2479_s2 = inlined_call_operand.hbm [shape: f32[1,256], index: 2, kind: input, shape index: {}]   ;;  %s2480_s3 = inlined_call_operand.hbm [shape: f32[64,128], index: 3, kind: input, shape index: {}]   ;;  %s2481_s4 = inlined_call_operand.vmem [shape: f32[1,128], index: 4, kind: input, shape index: {}]   ;;  %s2482_s5 = inlined_call_operand.hbm [shape: f32[16,128], index: 5, kind: output, shape index: {}]  }
   0x1   :  { %11 = vsyncpa [#allocation8], 0 }
   0x2   :  { %12 = vsyncpa [#allocation11], 0 }
   0x3   :  { %13 = vsyncpa [#allocation6], 0  ;;  %s31_s20 = sshll.u32 %s2478_s1, 4  ;;  %s2068_s21 = smov [#allocation7]   ;;  %s32_s20 = int_to_ptr.hbm [resolvable:$true] %s31_s20 }
   0x4   :  { %s33_s22 = sshll.u32 %s2068_s21, 4  ;;  %s18_s25 = sshll.u32 %s2477_s0, 4  ;;  %s34_s22 = int_to_ptr.vmem [resolvable:$true] %s33_s22  ;;  %s19_s25 = int_to_ptr.hbm [resolvable:$true] %s18_s25 }
   0x5   :  { %s2069_s26 = smov 256   ;;  %s2070_s27 = smov 16  }
   0x6   :  { %39 = dma.hbm_to_vmem [thread:$0]  %s32_s20, 2048, %s34_s22, [#allocation8], %s2069_s26, %s2069_s26, %s2070_s27  }
   0x7   :  { %s2071_s28 = smov [#allocation4]   ;;  %s45_s7 = sshll.u32 %s2479_s2, 4  ;;  %s46_s7 = int_to_ptr.hbm [resolvable:$true] %s45_s7 }
   0x8   :  { %s20_s29 = sshll.u32 %s2071_s28, 4  ;;  %s55_s9 = sshll.u32 %s2480_s3, 4  ;;  %s21_s29 = int_to_ptr.vmem [resolvable:$true] %s20_s29  ;;  %s56_s9 = int_to_ptr.hbm [resolvable:$true] %s55_s9 }
   0x9   :  { %26 = dma.hbm_to_vmem [thread:$0]  %s19_s25, 4096, %s21_s29, [#allocation5], %s2069_s26, %s2069_s26, %s2070_s27  }
   0xa   :  { %s2072_s10 = smov [#allocation9]   ;;  %s2073_s0 = smov [#allocation10]  }
   0xb   :  { %s47_s11 = sshll.u32 %s2072_s10, 4  ;;  %s57_s12 = sshll.u32 %s2073_s0, 4  ;;  %s48_s11 = int_to_ptr.vmem [resolvable:$true] %s47_s11  ;;  %s58_s12 = int_to_ptr.vmem [resolvable:$true] %s57_s12 }
   0xc   :  { %50 = dma.hbm_to_vmem [thread:$0]  %s46_s7, 32, %s48_s11, [#allocation8]  }
   0xd   :  { %s2074_s13 = smov 128   ;;  %s2075_s14 = smov 8  }
   0xe   :  { %63 = dma.hbm_to_vmem [thread:$0]  %s56_s9, 1024, %s58_s12, [#allocation11], %s2074_s13, %s2074_s13, %s2075_s14  }
   0xf   :  { %2060 = dma.done.wait [#allocation5], 4096  }
  0x10   :  { %2061 = vsyncadd [#allocation5], 4294963200 }
  0x11   :  { %2062 = dma.done.wait [#allocation8], 2080  }
  0x12   :  { %2063 = vsyncadd [#allocation8], 4294965216 }
  0x13   :  { %2064 = dma.done.wait [#allocation11], 1024  }
  0x14   :  { %2065 = vsyncadd [#allocation11], 4294966272  ;;  %vm86_vm0 = vcmask 523264   ;;  %v2076_v0 = vmov 0.0   ;;  %v2128_v1 = vld [vmem:[#allocation7 + $0x70] sm:$0xff]  ;;  %v2130_v2 = vld [vmem:[#allocation7 + $0x60] sm:$0xff] }
  0x15   :  { %87 = vst.msk [vmem:[#allocation2] sm:$0xff] %vm86_vm0, %v2076_v0  ;;  %130 = vmatpush.msra.mxu0 %v2128_v1  ;;  %v2133_v3 = vld [vmem:[#allocation7 + $0x78] sm:$0xff]  ;;  %295 = vmatpush.msra.mxu2 %v2128_v1  ;;  %v2136_v4 = vld [vmem:[#allocation7 + $0x50] sm:$0xff]  ;;  %v2139_v5 = vld [vmem:[#allocation7 + $0x68] sm:$0xff]  ;;  %s2077_s2 = smov 64   ;;  %s2078_s16 = smov [#allocation12]  }
  0x16   :  { %88 = vst.msk [vmem:[#allocation2 + $0x8] sm:$0xff] %vm86_vm0, %v2076_v0  ;;  %153 = vmatpush.msra.mxu1 %v2133_v3  ;;  %318 = vmatpush.msra.mxu3 %v2133_v3  ;;  %v2143_v6 = vld [vmem:[#allocation7 + $0x58] sm:$0xff]  ;;  %v2146_v7 = vld [vmem:[#allocation7 + $0x40] sm:$0xff]  ;;  %v2151_v8 = vld [vmem:[#allocation7 + $0x48] sm:$0xff]  ;;  %s1597_s17 = sshll.u32 %s2078_s16, 4  ;;  %s1599_s20 = sshll.u32 %s2482_s5, 4  ;;  %s1598_s17 = int_to_ptr.vmem [resolvable:$true] %s1597_s17  ;;  %s1600_s20 = int_to_ptr.hbm [resolvable:$true] %s1599_s20 }
  0x17   :  { %89 = vst.msk [vmem:[#allocation3] sm:$0xff] %vm86_vm0, %v2076_v0  ;;  %131 = vmatpush.msra.mxu0 %v2130_v2  ;;  %296 = vmatpush.msra.mxu2 %v2130_v2  ;;  %v2154_v9 = vld [vmem:[#allocation7 + $0x30] sm:$0xff]  ;;  %v2159_v12 = vld [vmem:[#allocation7 + $0x38] sm:$0xff]  ;;  %v2162_v13 = vld [vmem:[#allocation7 + $0x20] sm:$0xff] }
  0x18   :  { %90 = vst.msk [vmem:[#allocation3 + $0x8] sm:$0xff] %vm86_vm0, %v2076_v0  ;;  %154 = vmatpush.msra.mxu1 %v2139_v5  ;;  %319 = vmatpush.msra.mxu3 %v2139_v5  ;;  %v2167_v14 = vld [vmem:[#allocation7 + $0x28] sm:$0xff]  ;;  %v2170_v15 = vld [vmem:[#allocation7 + $0x10] sm:$0xff]  ;;  %v2175_v16 = vld [vmem:[#allocation7 + $0x18] sm:$0xff] }
  0x19   :  { %132 = vmatpush.msra.mxu0 %v2136_v4  ;;  %297 = vmatpush.msra.mxu2 %v2136_v4  ;;  %v2178_v17 = vld [vmem:[#allocation7] sm:$0xff]  ;;  %v2183_v19 = vld [vmem:[#allocation7 + $0x8] sm:$0xff]  ;;  %v113_v25 = vld [vmem:[#allocation4 + $0x10] sm:$0xff] }
  0x1a   :  { %155 = vmatpush.msra.mxu1 %v2143_v6  ;;  %320 = vmatpush.msra.mxu3 %v2143_v6  ;;  %v111_v21 = vld [vmem:[#allocation4] sm:$0xff]  ;;  %v112_v32 = vld [vmem:[#allocation4 + $0x8] sm:$0xff]  ;;  %v114_v40 = vld [vmem:[#allocation4 + $0x18] sm:$0xff] }
  0x1b   :  { %133 = vmatpush.msra.mxu0 %v2146_v7  ;;  %298 = vmatpush.msra.mxu2 %v2146_v7 }
  0x1c   :  { %156 = vmatpush.msra.mxu1 %v2151_v8  ;;  %321 = vmatpush.msra.mxu3 %v2151_v8  ;;  %v107_v18 = vld [vmem:[#allocation2] sm:$0xff] }
  0x1d   :  { %134 = vmatpush.msra.mxu0 %v2154_v9  ;;  %299 = vmatpush.msra.mxu2 %v2154_v9  ;;  %v108_v20 = vld [vmem:[#allocation2 + $0x8] sm:$0xff] }
  0x1e   :  { %v109_v10 = vld [vmem:[#allocation3] sm:$0xff]  ;;  %157 = vmatpush.msra.mxu1 %v2159_v12  ;;  %322 = vmatpush.msra.mxu3 %v2159_v12 }
  0x1f   :  { %v110_v11 = vld [vmem:[#allocation3 + $0x8] sm:$0xff]  ;;  %248 = vrot.lane.b32.xlu0 %v109_v10, %s2077_s2  ;;  %135 = vmatpush.msra.mxu0 %v2162_v13 }
  0x20   :  { %250 = vrot.lane.b32.xlu1 %v110_v11, %s2077_s2  ;;  %158 = vmatpush.msra.mxu1 %v2167_v14 }
  0x21   :  { %136 = vmatpush.msra.mxu0 %v2170_v15  ;;  %300 = vmatpush.msra.mxu2 %v2162_v13 }
  0x22   :  { %159 = vmatpush.msra.mxu1 %v2175_v16  ;;  %323 = vmatpush.msra.mxu3 %v2167_v14 }
  0x23   :  { %137 = vmatpush.msra.mxu0 %v2178_v17  ;;  %301 = vmatpush.msra.mxu2 %v2170_v15 }
  0x24   :  { %1614 = vmatmul.msk.f32.vlgmr.msra.gmra.mxu0 %vm86_vm0, %v107_v18  ;;  %160 = vmatpush.msra.mxu1 %v2183_v19 }
  0x25   :  { %1616 = vmatmul.msk.f32.vlgmr.msra.gmra.mxu1 %vm86_vm0, %v107_v18  ;;  %324 = vmatpush.msra.mxu3 %v2175_v16 }
  0x26   :  { %302 = vmatpush.msra.mxu2 %v2178_v17  ;;  %452 = vmatpush.msrb.mxu0 %v2128_v1 }
  0x27   :  { %325 = vmatpush.msra.mxu3 %v2183_v19  ;;  %475 = vmatpush.msrb.mxu1 %v2133_v3 }
  0x28   :  { %453 = vmatpush.msrb.mxu0 %v2130_v2  ;;  %609 = vmatpush.msrb.mxu2 %v2128_v1 }
  0x29   :  { %476 = vmatpush.msrb.mxu1 %v2139_v5  ;;  %632 = vmatpush.msrb.mxu3 %v2133_v3 }
  0x2a   :  { %454 = vmatpush.msrb.mxu0 %v2136_v4  ;;  %610 = vmatpush.msrb.mxu2 %v2130_v2 }
  0x2b   :  { %477 = vmatpush.msrb.mxu1 %v2143_v6  ;;  %633 = vmatpush.msrb.mxu3 %v2139_v5 }
  0x2c   :  { %1615 = vmatmul.msk.f32.gmra.mxu0 %vm86_vm0, %v108_v20  ;;  %611 = vmatpush.msrb.mxu2 %v2136_v4 }
  0x2d   :  { %1617 = vmatmul.msk.f32.gmra.mxu1 %vm86_vm0, %v108_v20  ;;  %455 = vmatpush.msrb.mxu0 %v2146_v7 }
  0x2e   :  { %478 = vmatpush.msrb.mxu1 %v2151_v8  ;;  %634 = vmatpush.msrb.mxu3 %v2143_v6 }
  0x2f   :  { %456 = vmatpush.msrb.mxu0 %v2154_v9  ;;  %612 = vmatpush.msrb.mxu2 %v2146_v7 }
  0x30   :  { %479 = vmatpush.msrb.mxu1 %v2159_v12  ;;  %635 = vmatpush.msrb.mxu3 %v2151_v8 }
  0x31   :  { %457 = vmatpush.msrb.mxu0 %v2162_v13  ;;  %613 = vmatpush.msrb.mxu2 %v2154_v9 }
  0x32   :  { %480 = vmatpush.msrb.mxu1 %v2167_v14  ;;  %636 = vmatpush.msrb.mxu3 %v2159_v12 }
  0x33   :  { %458 = vmatpush.msrb.mxu0 %v2170_v15  ;;  %614 = vmatpush.msrb.mxu2 %v2162_v13 }
  0x34   :  { %481 = vmatpush.msrb.mxu1 %v2175_v16  ;;  %637 = vmatpush.msrb.mxu3 %v2167_v14 }
  0x35   :  { %459 = vmatpush.msrb.mxu0 %v2178_v17  ;;  %615 = vmatpush.msrb.mxu2 %v2170_v15 }
  0x36   :  { %482 = vmatpush.msrb.mxu1 %v2183_v19  ;;  %638 = vmatpush.msrb.mxu3 %v2175_v16 }
  0x37   :  { %616 = vmatpush.msrb.mxu2 %v2178_v17  ;;  %766 = vmatpush.msra.mxu0 %v2128_v1 }
  0x38   :  { %639 = vmatpush.msrb.mxu3 %v2183_v19  ;;  %789 = vmatpush.msra.mxu1 %v2133_v3 }
  0x39   :  { %767 = vmatpush.msra.mxu0 %v2130_v2 }
  0x3a   :  { %790 = vmatpush.msra.mxu1 %v2139_v5 }
  0x3b   :  { %768 = vmatpush.msra.mxu0 %v2136_v4 }
  0x3c   :  { %791 = vmatpush.msra.mxu1 %v2143_v6 }
  0x3d   :  { %769 = vmatpush.msra.mxu0 %v2146_v7 }
  0x3e   :  { %792 = vmatpush.msra.mxu1 %v2151_v8 }
  0x3f   :  { %770 = vmatpush.msra.mxu0 %v2154_v9 }
  0x40   :  { %793 = vmatpush.msra.mxu1 %v2159_v12 }
  0x41   :  { %771 = vmatpush.msra.mxu0 %v2162_v13 }
  0x42   :  { %794 = vmatpush.msra.mxu1 %v2167_v14 }
  0x43   :  { %772 = vmatpush.msra.mxu0 %v2170_v15 }
  0x44   :  { %795 = vmatpush.msra.mxu1 %v2175_v16 }
  0x45   :  { %773 = vmatpush.msra.mxu0 %v2178_v17 }
  0x46   :  { %796 = vmatpush.msra.mxu1 %v2183_v19 }
  0xa1   :  { %v139_v22 = vpop.f32.mrf.mxu0 }
  0xa2   :  { %v140_v23 = vadd.f32 %v139_v22, %v111_v21  ;;  %v162_v31 = vpop.f32.mrf.mxu1 }
  0xa3   :  { %v163_v34 = vadd.f32 %v162_v31, %v112_v32 }
  0xa4   :  { %v1618_v24 = vmul.f32 -1.442695, %v140_v23  ;;  %v249_v23 = vpop.permute.xlu0 %248 }
  0xa5   :  { %v1619_v63 = vmul.f32 -1.442695, %v163_v34 }
  0xa6   :  { %1708 = vpow2.f32 %v1618_v24 }
  0xa9   :  { %v142_v26 = vpop.f32.mrf.mxu0 }
  0xaa   :  { %v143_v27 = vadd.f32 %v142_v26, %v113_v25  ;;  %v165_v41 = vpop.f32.mrf.mxu1 }
  0xab   :  { %v166_v47 = vadd.f32 %v165_v41, %v114_v40 }
  0xac   :  { %v1709_v28 = vpop.eup %1708  ;;  %v1620_v29 = vmul.f32 -1.442695, %v143_v27 }
  0xad   :  { %v180_v30 = vadd.f32 1.0, %v1709_v28  ;;  %v1621_v0 = vmul.f32 -1.442695, %v166_v47 }
  0xae   :  { %1710 = vpow2.f32 %v1620_v29  ;;  %v251_v29 = vpop.permute.xlu1 %250 }
  0xaf   :  { %1712 = vrcp.f32 %v180_v30  ;;  %v195_v39 = vand.u32 2147483648, %v180_v30  ;;  %v193_v43 = vand.u32 2147483647, %v180_v30  ;;  %vm189_vm2 = vweird.f32 %v180_v30 }
  0xb0   :  { %1714 = vtanh.f32 %v163_v34 }
  0xb1   :  { %v196_v48 = vor.u32 1.1754944e-38, %v195_v39  ;;  %vm194_vm4 = vcmp.eq.f32.partialorder %v193_v43, 8.507059e+37 }
  0xb4   :  { %v1711_v33 = vpop.eup %1710 }
  0xb5   :  { %v1713_v35 = vpop.eup %1712  ;;  %v182_v36 = vadd.f32 1.0, %v1711_v33 }
  0xb6   :  { %v185_v37 = vmul.f32 %v1713_v35, %v180_v30  ;;  %vm190_vm1 = vweird.f32 %v1713_v35  ;;  %v1715_v44 = vpop.eup %1714 }
  0xb7   :  { %1716 = vrcp.f32 %v182_v36  ;;  %vm191_vm3 = vmor %vm189_vm2, %vm190_vm1  ;;  %v225_v54 = vand.u32 2147483648, %v182_v36  ;;  %v223_v56 = vand.u32 2147483647, %v182_v36  ;;  %vm219_vm6 = vweird.f32 %v182_v36 }
  0xb8   :  { %v186_v38 = vsub.f32 1.0, %v185_v37  ;;  %1718 = vtanh.f32 %v166_v47 }
  0xb9   :  { %v226_v59 = vor.u32 1.1754944e-38, %v225_v54  ;;  %vm224_vm8 = vcmp.eq.f32.partialorder %v223_v56, 8.507059e+37  ;;  %1720 = vpow2.f32 %v1619_v63 }
  0xba   :  { %v187_v42 = vmul.f32 %v1713_v35, %v186_v38  ;;  %1722 = vpow2.f32 %v1621_v0 }
  0xbc   :  { %v188_v45 = vadd.f32 %v1713_v35, %v187_v42 }
  0xbd   :  { %v1717_v46 = vpop.eup %1716 }
  0xbe   :  { %v192_v49 = vsel %vm191_vm3, %v1713_v35, %v188_v45  ;;  %v215_v50 = vmul.f32 %v1717_v46, %v182_v36  ;;  %vm220_vm5 = vweird.f32 %v1717_v46  ;;  %v1719_v58 = vpop.eup %1718 }
  0xbf   :  { %v197_v51 = vsel %vm194_vm4, %v196_v48, %v192_v49  ;;  %vm221_vm7 = vmor %vm219_vm6, %vm220_vm5  ;;  %v1721_v10 = vpop.eup %1720 }
  0xc0   :  { %v256_v52 = vmul.f32 %v1715_v44, %v197_v51  ;;  %v216_v53 = vsub.f32 1.0, %v215_v50  ;;  %v181_v11 = vadd.f32 1.0, %v1721_v10  ;;  %v1723_v18 = vpop.eup %1722  ;;  %v254_v28 = vmul.f32 %v249_v23, %v197_v51 }
  0xc1   :  { %v183_v20 = vadd.f32 1.0, %v1723_v18 }
  0xc2   :  { %260 = vrot.lane.b32.xlu0 %v256_v52, %s2077_s2  ;;  %v217_v55 = vmul.f32 %v1717_v46, %v216_v53  ;;  %1724 = vrcp.f32 %v181_v11  ;;  %vm204_vm9 = vweird.f32 %v181_v11  ;;  %v210_v32 = vand.u32 2147483648, %v181_v11 }
  0xc3   :  { %1726 = vrcp.f32 %v183_v20  ;;  %v208_v34 = vand.u32 2147483647, %v181_v11  ;;  %vm234_vm13 = vweird.f32 %v183_v20  ;;  %v240_v44 = vand.u32 2147483648, %v183_v20 }
  0xc4   :  { %v218_v57 = vadd.f32 %v1717_v46, %v217_v55  ;;  %v211_v36 = vor.u32 1.1754944e-38, %v210_v32  ;;  %v238_v47 = vand.u32 2147483647, %v183_v20  ;;  %v273_v55 = vld [vmem:[#allocation4 + $0x20] sm:$0xff] }
  0xc5   :  { %vm209_vm12 = vcmp.eq.f32.partialorder %v208_v34, 8.507059e+37  ;;  %v241_v48 = vor.u32 1.1754944e-38, %v240_v44 }
  0xc6   :  { %v222_v60 = vsel %vm221_vm7, %v1717_v46, %v218_v57  ;;  %vm239_vm1 = vcmp.eq.f32.partialorder %v238_v47, 8.507059e+37 }
  0xc7   :  { %v227_v61 = vsel %vm224_vm8, %v226_v59, %v222_v60  ;;  %v275_v59 = vld [vmem:[#allocation4 + $0x30] sm:$0xff] }
  0xc8   :  { %v257_v62 = vmul.f32 %v1719_v58, %v227_v61  ;;  %v1725_v21 = vpop.eup %1724  ;;  %v255_v39 = vmul.f32 %v251_v29, %v227_v61 }
  0xc9   :  { %v200_v22 = vmul.f32 %v1725_v21, %v181_v11  ;;  %v1727_v25 = vpop.eup %1726  ;;  %vm205_vm10 = vweird.f32 %v1725_v21  ;;  %v274_v11 = vld [vmem:[#allocation4 + $0x28] sm:$0xff] }
  0xca   :  { %262 = vrot.lane.b32.xlu1 %v257_v62, %s2077_s2  ;;  %v230_v27 = vmul.f32 %v1727_v25, %v183_v20  ;;  %vm206_vm11 = vmor %vm204_vm9, %vm205_vm10  ;;  %vm235_vm14 = vweird.f32 %v1727_v25 }
  0xcb   :  { %v201_v24 = vsub.f32 1.0, %v200_v22  ;;  %vm236_vm15 = vmor %vm234_vm13, %vm235_vm14 }
  0xcc   :  { %v231_v35 = vsub.f32 1.0, %v230_v27 }
  0xcd   :  { %v202_v26 = vmul.f32 %v1725_v21, %v201_v24 }
  0xce   :  { %v232_v38 = vmul.f32 %v1727_v25, %v231_v35 }
  0xcf   :  { %v203_v33 = vadd.f32 %v1725_v21, %v202_v26  ;;  %v276_v26 = vld [vmem:[#allocation4 + $0x38] sm:$0xff] }
  0xd0   :  { %v233_v46 = vadd.f32 %v1727_v25, %v232_v38 }
  0xd1   :  { %v207_v37 = vsel %vm206_vm11, %v1725_v21, %v203_v33 }
  0xd2   :  { %v212_v43 = vsel %vm209_vm12, %v211_v36, %v207_v37  ;;  %v237_v49 = vsel %vm236_vm15, %v1727_v25, %v233_v46 }
  0xd3   :  { %v242_v51 = vsel %vm239_vm1, %v241_v48, %v237_v49 }
 0x134   :  { %v261_v30 = vpop.permute.xlu0 %260 }
 0x135   :  { %v2248_v31 = vadd.f32 %v261_v30, %v254_v28 }
 0x137   :  { %1728 = vtanh.f32 %v2248_v31 }
 0x13c   :  { %v263_v40 = vpop.permute.xlu1 %262 }
 0x13d   :  { %v1729_v41 = vpop.eup %1728  ;;  %v2251_v42 = vadd.f32 %v263_v40, %v255_v39 }
 0x13e   :  { %v270_v45 = vmul.f32 %v1729_v41, %v212_v43 }
 0x13f   :  { %1730 = vtanh.f32 %v2251_v42 }
 0x140   :  { %279 = vrot.lane.b32.xlu2 %v270_v45, %s2077_s2 }
 0x145   :  { %v1731_v50 = vpop.eup %1730 }
 0x146   :  { %v271_v52 = vmul.f32 %v1731_v50, %v242_v51 }
 0x148   :  { %281 = vrot.lane.b32.xlu2 %v271_v52, %s2077_s2 }
 0x19a   :  { %v280_v53 = vpop.permute.xlu2 %279 }
 0x19b   :  { %1622 = vmatmul.msk.f32.vlgmr.msra.gmra.mxu2 %vm86_vm0, %v280_v53  ;;  %1624 = vmatmul.msk.f32.vlgmr.msra.gmra.mxu3 %vm86_vm0, %v280_v53 }
 0x19c   :  { %923 = vmatpush.msra.mxu2 %v2128_v1  ;;  %946 = vmatpush.msra.mxu3 %v2133_v3 }
 0x19e   :  { %924 = vmatpush.msra.mxu2 %v2130_v2  ;;  %947 = vmatpush.msra.mxu3 %v2139_v5 }
 0x1a0   :  { %925 = vmatpush.msra.mxu2 %v2136_v4  ;;  %948 = vmatpush.msra.mxu3 %v2143_v6 }
 0x1a2   :  { %v282_v54 = vpop.permute.xlu2 %281  ;;  %926 = vmatpush.msra.mxu2 %v2146_v7  ;;  %949 = vmatpush.msra.mxu3 %v2151_v8 }
 0x1a3   :  { %1623 = vmatmul.msk.f32.gmra.mxu2 %vm86_vm0, %v282_v54  ;;  %1625 = vmatmul.msk.f32.gmra.mxu3 %vm86_vm0, %v282_v54 }
 0x1a4   :  { %927 = vmatpush.msra.mxu2 %v2154_v9  ;;  %950 = vmatpush.msra.mxu3 %v2159_v12 }
 0x1a6   :  { %928 = vmatpush.msra.mxu2 %v2162_v13  ;;  %951 = vmatpush.msra.mxu3 %v2167_v14 }
 0x1a8   :  { %929 = vmatpush.msra.mxu2 %v2170_v15  ;;  %952 = vmatpush.msra.mxu3 %v2175_v16 }
 0x1aa   :  { %930 = vmatpush.msra.mxu2 %v2178_v17  ;;  %953 = vmatpush.msra.mxu3 %v2183_v19 }
 0x21e   :  { %v304_v56 = vpop.f32.mrf.mxu2  ;;  %v327_v10 = vpop.f32.mrf.mxu3 }
 0x21f   :  { %v305_v57 = vadd.f32 %v304_v56, %v273_v55  ;;  %v328_v21 = vadd.f32 %v327_v10, %v274_v11 }
 0x221   :  { %v1626_v58 = vmul.f32 -1.442695, %v305_v57  ;;  %v1627_v51 = vmul.f32 -1.442695, %v328_v21 }
 0x223   :  { %1732 = vpow2.f32 %v1626_v58 }
 0x226   :  { %v307_v60 = vpop.f32.mrf.mxu2  ;;  %v330_v27 = vpop.f32.mrf.mxu3 }
 0x227   :  { %v308_v61 = vadd.f32 %v307_v60, %v275_v59  ;;  %v331_v33 = vadd.f32 %v330_v27, %v276_v26 }
 0x229   :  { %v1733_v62 = vpop.eup %1732  ;;  %v1628_v63 = vmul.f32 -1.442695, %v308_v61  ;;  %v1629_v52 = vmul.f32 -1.442695, %v331_v33 }
 0x22a   :  { %v345_v0 = vadd.f32 1.0, %v1733_v62 }
 0x22b   :  { %1734 = vpow2.f32 %v1628_v63 }
 0x22c   :  { %1736 = vrcp.f32 %v345_v0  ;;  %v360_v25 = vand.u32 2147483648, %v345_v0  ;;  %v358_v29 = vand.u32 2147483647, %v345_v0  ;;  %vm354_vm3 = vweird.f32 %v345_v0 }
 0x22e   :  { %v361_v34 = vor.u32 1.1754944e-38, %v360_v25  ;;  %vm359_vm5 = vcmp.eq.f32.partialorder %v358_v29, 8.507059e+37 }
 0x231   :  { %v1735_v18 = vpop.eup %1734 }
 0x232   :  { %v1737_v20 = vpop.eup %1736  ;;  %v347_v22 = vadd.f32 1.0, %v1735_v18 }
 0x233   :  { %v350_v23 = vmul.f32 %v1737_v20, %v345_v0  ;;  %vm355_vm2 = vweird.f32 %v1737_v20 }
 0x234   :  { %1738 = vrcp.f32 %v347_v22  ;;  %vm356_vm4 = vmor %vm354_vm3, %vm355_vm2  ;;  %v390_v41 = vand.u32 2147483648, %v347_v22  ;;  %v388_v44 = vand.u32 2147483647, %v347_v22  ;;  %vm384_vm7 = vweird.f32 %v347_v22 }
 0x235   :  { %v351_v24 = vsub.f32 1.0, %v350_v23  ;;  %1740 = vtanh.f32 %v328_v21 }
 0x236   :  { %1742 = vtanh.f32 %v331_v33  ;;  %v391_v46 = vor.u32 1.1754944e-38, %v390_v41  ;;  %vm389_vm9 = vcmp.eq.f32.partialorder %v388_v44, 8.507059e+37 }
 0x237   :  { %v352_v28 = vmul.f32 %v1737_v20, %v351_v24  ;;  %1744 = vpow2.f32 %v1627_v51 }
 0x238   :  { %1746 = vpow2.f32 %v1629_v52 }
 0x239   :  { %v353_v30 = vadd.f32 %v1737_v20, %v352_v28 }
 0x23a   :  { %v1739_v32 = vpop.eup %1738 }
 0x23b   :  { %v380_v35 = vmul.f32 %v1739_v32, %v347_v22  ;;  %v357_v36 = vsel %vm356_vm4, %v1737_v20, %v353_v30  ;;  %v1741_v37 = vpop.eup %1740  ;;  %vm385_vm6 = vweird.f32 %v1739_v32 }
 0x23c   :  { %v362_v38 = vsel %vm359_vm5, %v361_v34, %v357_v36  ;;  %vm386_vm8 = vmor %vm384_vm7, %vm385_vm6  ;;  %v1743_v48 = vpop.eup %1742 }
 0x23d   :  { %v413_v39 = vmul.f32 %v1741_v37, %v362_v38  ;;  %v381_v40 = vsub.f32 1.0, %v380_v35  ;;  %v1745_v53 = vpop.eup %1744  ;;  %v411_v63 = vmul.f32 %v362_v38, %v2248_v31 }
 0x23e   :  { %v346_v54 = vadd.f32 1.0, %v1745_v53  ;;  %v1747_v55 = vpop.eup %1746 }
 0x23f   :  { %417 = vrot.lane.b32.xlu0 %v413_v39, %s2077_s2  ;;  %v382_v43 = vmul.f32 %v1739_v32, %v381_v40  ;;  %v348_v56 = vadd.f32 1.0, %v1747_v55  ;;  %v430_v40 = vld [vmem:[#allocation4 + $0x40] sm:$0xff] }
 0x240   :  { %1748 = vrcp.f32 %v346_v54  ;;  %v375_v20 = vand.u32 2147483648, %v346_v54  ;;  %vm369_vm11 = vweird.f32 %v346_v54  ;;  %v373_v21 = vand.u32 2147483647, %v346_v54 }
 0x241   :  { %v383_v45 = vadd.f32 %v1739_v32, %v382_v43  ;;  %1750 = vrcp.f32 %v348_v56  ;;  %vm399_vm15 = vweird.f32 %v348_v56  ;;  %v403_v33 = vand.u32 2147483647, %v348_v56 }
 0x242   :  { %v376_v25 = vor.u32 1.1754944e-38, %v375_v20  ;;  %vm374_vm13 = vcmp.eq.f32.partialorder %v373_v21, 8.507059e+37  ;;  %v433_v21 = vld [vmem:[#allocation4 + $0x58] sm:$0xff] }
 0x243   :  { %v387_v47 = vsel %vm386_vm8, %v1739_v32, %v383_v45  ;;  %v405_v32 = vand.u32 2147483648, %v348_v56  ;;  %vm404_vm2 = vcmp.eq.f32.partialorder %v403_v33, 8.507059e+37 }
 0x244   :  { %v392_v49 = vsel %vm389_vm9, %v391_v46, %v387_v47  ;;  %v431_v47 = vld [vmem:[#allocation4 + $0x48] sm:$0xff] }
 0x245   :  { %v414_v50 = vmul.f32 %v1743_v48, %v392_v49  ;;  %v412_v24 = vmul.f32 %v392_v49, %v2251_v42  ;;  %v406_v42 = vor.u32 1.1754944e-38, %v405_v32 }
 0x246   :  { %v1749_v57 = vpop.eup %1748 }
 0x247   :  { %419 = vrot.lane.b32.xlu1 %v414_v50, %s2077_s2  ;;  %v365_v58 = vmul.f32 %v1749_v57, %v346_v54  ;;  %v1751_v60 = vpop.eup %1750  ;;  %vm370_vm10 = vweird.f32 %v1749_v57 }
 0x248   :  { %v395_v62 = vmul.f32 %v1751_v60, %v348_v56  ;;  %vm371_vm12 = vmor %vm369_vm11, %vm370_vm10  ;;  %vm400_vm14 = vweird.f32 %v1751_v60 }
 0x249   :  { %v366_v59 = vsub.f32 1.0, %v365_v58  ;;  %vm401_vm1 = vmor %vm399_vm15, %vm400_vm14 }
 0x24a   :  { %v396_v18 = vsub.f32 1.0, %v395_v62 }
 0x24b   :  { %v367_v61 = vmul.f32 %v1749_v57, %v366_v59 }
 0x24c   :  { %v397_v23 = vmul.f32 %v1751_v60, %v396_v18 }
 0x24d   :  { %v368_v11 = vadd.f32 %v1749_v57, %v367_v61 }
 0x24e   :  { %v398_v30 = vadd.f32 %v1751_v60, %v397_v23 }
 0x24f   :  { %v372_v22 = vsel %vm371_vm12, %v1749_v57, %v368_v11 }
 0x250   :  { %v377_v28 = vsel %vm374_vm13, %v376_v25, %v372_v22  ;;  %v402_v34 = vsel %vm401_vm1, %v1751_v60, %v398_v30  ;;  %v432_v60 = vld [vmem:[#allocation4 + $0x50] sm:$0xff] }
 0x251   :  { %v407_v36 = vsel %vm404_vm2, %v406_v42, %v402_v34 }
 0x2b1   :  { %v418_v0 = vpop.permute.xlu0 %417 }
 0x2b2   :  { %v2279_v10 = vadd.f32 %v418_v0, %v411_v63 }
 0x2b4   :  { %1752 = vtanh.f32 %v2279_v10 }
 0x2b9   :  { %v420_v26 = vpop.permute.xlu1 %419 }
 0x2ba   :  { %v1753_v31 = vpop.eup %1752  ;;  %v2283_v27 = vadd.f32 %v420_v26, %v412_v24 }
 0x2bb   :  { %v427_v29 = vmul.f32 %v1753_v31, %v377_v28 }
 0x2bc   :  { %1754 = vtanh.f32 %v2283_v27 }
 0x2bd   :  { %436 = vrot.lane.b32.xlu2 %v427_v29, %s2077_s2 }
 0x2c2   :  { %v1755_v35 = vpop.eup %1754 }
 0x2c3   :  { %v428_v37 = vmul.f32 %v1755_v35, %v407_v36 }
 0x2c5   :  { %438 = vrot.lane.b32.xlu0 %v428_v37, %s2077_s2 }
 0x317   :  { %v437_v38 = vpop.permute.xlu2 %436 }
 0x318   :  { %1630 = vmatmul.msk.f32.vlgmr.msrb.gmra.mxu0 %vm86_vm0, %v437_v38  ;;  %1632 = vmatmul.msk.f32.vlgmr.msrb.gmra.mxu1 %vm86_vm0, %v437_v38 }
 0x319   :  { %1080 = vmatpush.msrb.mxu0 %v2128_v1  ;;  %1103 = vmatpush.msrb.mxu1 %v2133_v3 }
 0x31b   :  { %1081 = vmatpush.msrb.mxu0 %v2130_v2  ;;  %1104 = vmatpush.msrb.mxu1 %v2139_v5 }
 0x31d   :  { %1082 = vmatpush.msrb.mxu0 %v2136_v4  ;;  %1105 = vmatpush.msrb.mxu1 %v2143_v6 }
 0x31f   :  { %1083 = vmatpush.msrb.mxu0 %v2146_v7  ;;  %1106 = vmatpush.msrb.mxu1 %v2151_v8 }
 0x321   :  { %1084 = vmatpush.msrb.mxu0 %v2154_v9  ;;  %1107 = vmatpush.msrb.mxu1 %v2159_v12 }
 0x323   :  { %1085 = vmatpush.msrb.mxu0 %v2162_v13  ;;  %1108 = vmatpush.msrb.mxu1 %v2167_v14 }
 0x325   :  { %1086 = vmatpush.msrb.mxu0 %v2170_v15  ;;  %1109 = vmatpush.msrb.mxu1 %v2175_v16 }
 0x327   :  { %1087 = vmatpush.msrb.mxu0 %v2178_v17  ;;  %1110 = vmatpush.msrb.mxu1 %v2183_v19 }
 0x337   :  { %v439_v39 = vpop.permute.xlu0 %438 }
 0x338   :  { %1631 = vmatmul.msk.f32.gmra.mxu0 %vm86_vm0, %v439_v39  ;;  %1633 = vmatmul.msk.f32.gmra.mxu1 %vm86_vm0, %v439_v39 }
 0x395   :  { %v461_v41 = vpop.f32.mrf.mxu0  ;;  %v484_v48 = vpop.f32.mrf.mxu1 }
 0x396   :  { %v462_v43 = vadd.f32 %v461_v41, %v430_v40  ;;  %v485_v50 = vadd.f32 %v484_v48, %v431_v47 }
 0x398   :  { %v1634_v44 = vmul.f32 -1.442695, %v462_v43  ;;  %v1635_v36 = vmul.f32 -1.442695, %v485_v50 }
 0x39a   :  { %1756 = vpow2.f32 %v1634_v44 }
 0x3a0   :  { %v1757_v45 = vpop.eup %1756 }
 0x3a1   :  { %v502_v46 = vadd.f32 1.0, %v1757_v45 }
 0x3a3   :  { %1758 = vrcp.f32 %v502_v46  ;;  %v517_v53 = vand.u32 2147483648, %v502_v46  ;;  %v515_v55 = vand.u32 2147483647, %v502_v46  ;;  %vm511_vm4 = vweird.f32 %v502_v46 }
 0x3a4   :  { %1760 = vtanh.f32 %v485_v50 }
 0x3a5   :  { %v518_v57 = vor.u32 1.1754944e-38, %v517_v53  ;;  %vm516_vm6 = vcmp.eq.f32.partialorder %v515_v55, 8.507059e+37 }
 0x3a9   :  { %v1759_v49 = vpop.eup %1758 }
 0x3aa   :  { %v507_v51 = vmul.f32 %v1759_v49, %v502_v46  ;;  %vm512_vm3 = vweird.f32 %v1759_v49  ;;  %v1761_v59 = vpop.eup %1760 }
 0x3ab   :  { %vm513_vm5 = vmor %vm511_vm4, %vm512_vm3 }
 0x3ac   :  { %v508_v52 = vsub.f32 1.0, %v507_v51 }
 0x3ae   :  { %v509_v54 = vmul.f32 %v1759_v49, %v508_v52 }
 0x3b0   :  { %v510_v56 = vadd.f32 %v1759_v49, %v509_v54 }
 0x3b2   :  { %v514_v58 = vsel %vm513_vm5, %v1759_v49, %v510_v56 }
 0x3b3   :  { %v519_v61 = vsel %vm516_vm6, %v518_v57, %v514_v58 }
 0x3b4   :  { %v570_v62 = vmul.f32 %v1761_v59, %v519_v61  ;;  %v568_v49 = vmul.f32 %v519_v61, %v2279_v10 }
 0x3b5   :  { %v464_v63 = vpop.f32.mrf.mxu0  ;;  %v487_v22 = vpop.f32.mrf.mxu1 }
 0x3b6   :  { %v465_v0 = vadd.f32 %v464_v63, %v432_v60  ;;  %574 = vrot.lane.b32.xlu1 %v570_v62, %s2077_s2  ;;  %v488_v24 = vadd.f32 %v487_v22, %v433_v21 }
 0x3b8   :  { %v1636_v11 = vmul.f32 -1.442695, %v465_v0  ;;  %v1637_v37 = vmul.f32 -1.442695, %v488_v24 }
 0x3ba   :  { %1762 = vpow2.f32 %v1636_v11 }
 0x3c0   :  { %v1763_v18 = vpop.eup %1762 }
 0x3c1   :  { %v504_v20 = vadd.f32 1.0, %v1763_v18 }
 0x3c3   :  { %1764 = vrcp.f32 %v504_v20  ;;  %v547_v31 = vand.u32 2147483648, %v504_v20  ;;  %v545_v29 = vand.u32 2147483647, %v504_v20  ;;  %vm541_vm8 = vweird.f32 %v504_v20 }
 0x3c4   :  { %1766 = vtanh.f32 %v488_v24 }
 0x3c5   :  { %v548_v32 = vor.u32 1.1754944e-38, %v547_v31  ;;  %vm546_vm10 = vcmp.eq.f32.partialorder %v545_v29, 8.507059e+37  ;;  %1768 = vpow2.f32 %v1635_v36  ;;  %v590_v29 = vld [vmem:[#allocation4 + $0x78] sm:$0xff] }
 0x3c6   :  { %1770 = vpow2.f32 %v1637_v37 }
 0x3c9   :  { %v1765_v23 = vpop.eup %1764 }
 0x3ca   :  { %v537_v25 = vmul.f32 %v1765_v23, %v504_v20  ;;  %vm542_vm7 = vweird.f32 %v1765_v23  ;;  %v1767_v34 = vpop.eup %1766 }
 0x3cb   :  { %vm543_vm9 = vmor %vm541_vm8, %vm542_vm7  ;;  %v1769_v38 = vpop.eup %1768 }
 0x3cc   :  { %v538_v26 = vsub.f32 1.0, %v537_v25  ;;  %v503_v39 = vadd.f32 1.0, %v1769_v38  ;;  %v1771_v40 = vpop.eup %1770 }
 0x3cd   :  { %v505_v41 = vadd.f32 1.0, %v1771_v40 }
 0x3ce   :  { %v539_v28 = vmul.f32 %v1765_v23, %v538_v26  ;;  %1772 = vrcp.f32 %v503_v39  ;;  %v532_v54 = vand.u32 2147483648, %v503_v39  ;;  %vm526_vm12 = vweird.f32 %v503_v39 }
 0x3cf   :  { %1774 = vrcp.f32 %v505_v41  ;;  %v530_v55 = vand.u32 2147483647, %v503_v39  ;;  %v562_v11 = vand.u32 2147483648, %v505_v41  ;;  %vm556_vm1 = vweird.f32 %v505_v41 }
 0x3d0   :  { %v540_v30 = vadd.f32 %v1765_v23, %v539_v28  ;;  %v533_v59 = vor.u32 1.1754944e-38, %v532_v54  ;;  %v560_v18 = vand.u32 2147483647, %v505_v41 }
 0x3d1   :  { %vm531_vm14 = vcmp.eq.f32.partialorder %v530_v55, 8.507059e+37 }
 0x3d2   :  { %v544_v33 = vsel %vm543_vm9, %v1765_v23, %v540_v30  ;;  %vm561_vm3 = vcmp.eq.f32.partialorder %v560_v18, 8.507059e+37 }
 0x3d3   :  { %v549_v42 = vsel %vm546_vm10, %v548_v32, %v544_v33 }
 0x3d4   :  { %v571_v35 = vmul.f32 %v1767_v34, %v549_v42  ;;  %v1773_v43 = vpop.eup %1772  ;;  %v569_v58 = vmul.f32 %v549_v42, %v2283_v27  ;;  %v563_v27 = vor.u32 1.1754944e-38, %v562_v11 }
 0x3d5   :  { %v522_v44 = vmul.f32 %v1773_v43, %v503_v39  ;;  %v1775_v46 = vpop.eup %1774  ;;  %vm527_vm11 = vweird.f32 %v1773_v43 }
 0x3d6   :  { %576 = vrot.lane.b32.xlu2 %v571_v35, %s2077_s2  ;;  %v552_v48 = vmul.f32 %v1775_v46, %v505_v41  ;;  %vm528_vm13 = vmor %vm526_vm12, %vm527_vm11  ;;  %vm557_vm15 = vweird.f32 %v1775_v46 }
 0x3d7   :  { %v523_v45 = vsub.f32 1.0, %v522_v44  ;;  %vm558_vm2 = vmor %vm556_vm1, %vm557_vm15 }
 0x3d8   :  { %v553_v53 = vsub.f32 1.0, %v552_v48 }
 0x3d9   :  { %v524_v47 = vmul.f32 %v1773_v43, %v523_v45 }
 0x3da   :  { %v554_v57 = vmul.f32 %v1775_v46, %v553_v53 }
 0x3db   :  { %v525_v50 = vadd.f32 %v1773_v43, %v524_v47 }
 0x3dc   :  { %v555_v0 = vadd.f32 %v1775_v46, %v554_v57 }
 0x3dd   :  { %v529_v56 = vsel %vm528_vm13, %v1773_v43, %v525_v50 }
 0x3de   :  { %v534_v62 = vsel %vm531_vm14, %v533_v59, %v529_v56  ;;  %v559_v20 = vsel %vm558_vm2, %v1775_v46, %v555_v0 }
 0x3df   :  { %v564_v22 = vsel %vm561_vm3, %v563_v27, %v559_v20 }
 0x428   :  { %v575_v51 = vpop.permute.xlu1 %574 }
 0x429   :  { %v2311_v52 = vadd.f32 %v575_v51, %v568_v49 }
 0x42b   :  { %1776 = vtanh.f32 %v2311_v52 }
 0x430   :  { %v577_v60 = vpop.permute.xlu2 %576 }
 0x431   :  { %v1777_v10 = vpop.eup %1776  ;;  %v2315_v61 = vadd.f32 %v577_v60, %v569_v58 }
 0x432   :  { %v584_v63 = vmul.f32 %v1777_v10, %v534_v62 }
 0x433   :  { %1778 = vtanh.f32 %v2315_v61 }
 0x434   :  { %593 = vrot.lane.b32.xlu0 %v584_v63, %s2077_s2 }
 0x439   :  { %v1779_v21 = vpop.eup %1778 }
 0x43a   :  { %v585_v23 = vmul.f32 %v1779_v21, %v564_v22 }
 0x43c   :  { %595 = vrot.lane.b32.xlu1 %v585_v23, %s2077_s2 }
 0x4a6   :  { %v594_v24 = vpop.permute.xlu0 %593 }
 0x4a7   :  { %1638 = vmatmul.msk.f32.vlgmr.msrb.gmra.mxu2 %vm86_vm0, %v594_v24  ;;  %1640 = vmatmul.msk.f32.vlgmr.msrb.gmra.mxu3 %vm86_vm0, %v594_v24 }
 0x4a8   :  { %1237 = vmatpush.msrb.mxu2 %v2128_v1  ;;  %1260 = vmatpush.msrb.mxu3 %v2133_v3  ;;  %v587_v1 = vld [vmem:[#allocation4 + $0x60] sm:$0xff] }
 0x4aa   :  { %1238 = vmatpush.msrb.mxu2 %v2130_v2  ;;  %1261 = vmatpush.msrb.mxu3 %v2139_v5  ;;  %v589_v5 = vld [vmem:[#allocation4 + $0x70] sm:$0xff] }
 0x4ac   :  { %1239 = vmatpush.msrb.mxu2 %v2136_v4  ;;  %1262 = vmatpush.msrb.mxu3 %v2143_v6 }
 0x4ae   :  { %v596_v25 = vpop.permute.xlu1 %595  ;;  %1240 = vmatpush.msrb.mxu2 %v2146_v7  ;;  %1263 = vmatpush.msrb.mxu3 %v2151_v8 }
 0x4af   :  { %1639 = vmatmul.msk.f32.gmra.mxu2 %vm86_vm0, %v596_v25  ;;  %1641 = vmatmul.msk.f32.gmra.mxu3 %vm86_vm0, %v596_v25 }
 0x4b0   :  { %1241 = vmatpush.msrb.mxu2 %v2154_v9  ;;  %1264 = vmatpush.msrb.mxu3 %v2159_v12 }
 0x4b2   :  { %1242 = vmatpush.msrb.mxu2 %v2162_v13  ;;  %1265 = vmatpush.msrb.mxu3 %v2167_v14  ;;  %v588_v14 = vld [vmem:[#allocation4 + $0x68] sm:$0xff] }
 0x4b4   :  { %1243 = vmatpush.msrb.mxu2 %v2170_v15  ;;  %1266 = vmatpush.msrb.mxu3 %v2175_v16 }
 0x4b6   :  { %1244 = vmatpush.msrb.mxu2 %v2178_v17  ;;  %1267 = vmatpush.msrb.mxu3 %v2183_v19 }
 0x52a   :  { %v618_v2 = vpop.f32.mrf.mxu2  ;;  %v641_v13 = vpop.f32.mrf.mxu3 }
 0x52b   :  { %v619_v3 = vadd.f32 %v618_v2, %v587_v1  ;;  %v642_v17 = vadd.f32 %v641_v13, %v588_v14 }
 0x52d   :  { %v1642_v4 = vmul.f32 -1.442695, %v619_v3  ;;  %v1643_v54 = vmul.f32 -1.442695, %v642_v17 }
 0x52f   :  { %1780 = vpow2.f32 %v1642_v4 }
 0x532   :  { %v621_v6 = vpop.f32.mrf.mxu2  ;;  %v644_v30 = vpop.f32.mrf.mxu3 }
 0x533   :  { %v622_v7 = vadd.f32 %v621_v6, %v589_v5  ;;  %v645_v35 = vadd.f32 %v644_v30, %v590_v29  ;;  %v2360_v29 = vld [vmem:[#allocation7 + $0x50] sm:$0xff]  ;;  %v1929_v30 = vld [vmem:[#allocation7 + $0x58] sm:$0xff] }
 0x535   :  { %v1781_v8 = vpop.eup %1780  ;;  %v1644_v9 = vmul.f32 -1.442695, %v622_v7  ;;  %v1645_v60 = vmul.f32 -1.442695, %v645_v35 }
 0x536   :  { %v659_v12 = vadd.f32 1.0, %v1781_v8 }
 0x537   :  { %1782 = vpow2.f32 %v1644_v9 }
 0x538   :  { %1784 = vrcp.f32 %v659_v12  ;;  %v674_v28 = vand.u32 2147483648, %v659_v12  ;;  %v672_v33 = vand.u32 2147483647, %v659_v12  ;;  %vm668_vm5 = vweird.f32 %v659_v12 }
 0x53a   :  { %v675_v36 = vor.u32 1.1754944e-38, %v674_v28  ;;  %vm673_vm7 = vcmp.eq.f32.partialorder %v672_v33, 8.507059e+37  ;;  %v1927_v28 = vld [vmem:[#allocation7 + $0x68] sm:$0xff]  ;;  %v2363_v33 = vld [vmem:[#allocation7 + $0x40] sm:$0xff] }
 0x53d   :  { %v1783_v15 = vpop.eup %1782 }
 0x53e   :  { %v1785_v16 = vpop.eup %1784  ;;  %v661_v26 = vadd.f32 1.0, %v1783_v15 }
 0x53f   :  { %v664_v19 = vmul.f32 %v1785_v16, %v659_v12  ;;  %vm669_vm4 = vweird.f32 %v1785_v16 }
 0x540   :  { %1786 = vrcp.f32 %v661_v26  ;;  %vm670_vm6 = vmor %vm668_vm5, %vm669_vm4  ;;  %v704_v44 = vand.u32 2147483648, %v661_v26  ;;  %v702_v46 = vand.u32 2147483647, %v661_v26  ;;  %vm698_vm9 = vweird.f32 %v661_v26 }
 0x541   :  { %v665_v31 = vsub.f32 1.0, %v664_v19  ;;  %1788 = vtanh.f32 %v642_v17  ;;  %v1925_v19 = vld [vmem:[#allocation7 + $0x78] sm:$0xff] }
 0x542   :  { %1790 = vtanh.f32 %v645_v35  ;;  %v705_v48 = vor.u32 1.1754944e-38, %v704_v44  ;;  %vm703_vm11 = vcmp.eq.f32.partialorder %v702_v46, 8.507059e+37  ;;  %v1933_v35 = vld [vmem:[#allocation7 + $0x38] sm:$0xff] }
 0x543   :  { %v666_v32 = vmul.f32 %v1785_v16, %v665_v31  ;;  %1792 = vpow2.f32 %v1643_v54  ;;  %v2357_v31 = vld [vmem:[#allocation7 + $0x60] sm:$0xff] }
 0x545   :  { %v667_v34 = vadd.f32 %v1785_v16, %v666_v32 }
 0x546   :  { %v1787_v42 = vpop.eup %1786 }
 0x547   :  { %v694_v37 = vmul.f32 %v1787_v42, %v661_v26  ;;  %v671_v38 = vsel %vm670_vm6, %v1785_v16, %v667_v34  ;;  %v1789_v39 = vpop.eup %1788  ;;  %vm699_vm8 = vweird.f32 %v1787_v42  ;;  %v2354_v26 = vld [vmem:[#allocation7 + $0x70] sm:$0xff]  ;;  %v1931_v34 = vld [vmem:[#allocation7 + $0x48] sm:$0xff] }
 0x548   :  { %v676_v40 = vsel %vm673_vm7, %v675_v36, %v671_v38  ;;  %vm700_vm10 = vmor %vm698_vm9, %vm699_vm8  ;;  %v1791_v51 = vpop.eup %1790  ;;  %v2371_v36 = vld [vmem:[#allocation7 + $0x20] sm:$0xff]  ;;  %v2374_v38 = vld [vmem:[#allocation7 + $0x10] sm:$0xff] }
 0x549   :  { %v727_v41 = vmul.f32 %v1789_v39, %v676_v40  ;;  %v695_v43 = vsub.f32 1.0, %v694_v37  ;;  %v1793_v55 = vpop.eup %1792  ;;  %v725_v62 = vmul.f32 %v676_v40, %v2311_v52  ;;  %v1935_v37 = vld [vmem:[#allocation7 + $0x28] sm:$0xff]  ;;  %v1937_v39 = vld [vmem:[#allocation7 + $0x18] sm:$0xff]  ;;  %v2377_v40 = vld [vmem:[#allocation7] sm:$0xff] }
 0x54a   :  { %v660_v56 = vadd.f32 1.0, %v1793_v55  ;;  %v745_v55 = vld [vmem:[#allocation4 + $0x88] sm:$0xff] }
 0x54b   :  { %731 = vrot.lane.b32.xlu2 %v727_v41, %s2077_s2  ;;  %v696_v45 = vmul.f32 %v1787_v42, %v695_v43  ;;  %v1939_v41 = vld [vmem:[#allocation7 + $0x8] sm:$0xff]  ;;  %v744_v43 = vld [vmem:[#allocation4 + $0x80] sm:$0xff] }
 0x54c   :  { %1794 = vrcp.f32 %v660_v56  ;;  %v689_v18 = vand.u32 2147483648, %v660_v56  ;;  %vm683_vm13 = vweird.f32 %v660_v56  ;;  %v687_v20 = vand.u32 2147483647, %v660_v56 }
 0x54d   :  { %v697_v47 = vadd.f32 %v1787_v42, %v696_v45  ;;  %1796 = vpow2.f32 %v1645_v60 }
 0x54e   :  { %v690_v22 = vor.u32 1.1754944e-38, %v689_v18  ;;  %vm688_vm15 = vcmp.eq.f32.partialorder %v687_v20, 8.507059e+37 }
 0x54f   :  { %v701_v49 = vsel %vm700_vm10, %v1787_v42, %v697_v47  ;;  %v2368_v42 = vld [vmem:[#allocation7 + $0x30] sm:$0xff] }
 0x550   :  { %v706_v50 = vsel %vm703_vm11, %v705_v48, %v701_v49  ;;  %v746_v47 = vld [vmem:[#allocation4 + $0x90] sm:$0xff] }
 0x551   :  { %v728_v53 = vmul.f32 %v1791_v51, %v706_v50  ;;  %v726_v5 = vmul.f32 %v706_v50, %v2315_v61 }
 0x552   :  { %v1795_v57 = vpop.eup %1794 }
 0x553   :  { %733 = vrot.lane.b32.xlu0 %v728_v53, %s2077_s2  ;;  %v679_v58 = vmul.f32 %v1795_v57, %v660_v56  ;;  %vm684_vm12 = vweird.f32 %v1795_v57  ;;  %v1797_v27 = vpop.eup %1796 }
 0x554   :  { %vm685_vm14 = vmor %vm683_vm13, %vm684_vm12  ;;  %v662_v24 = vadd.f32 1.0, %v1797_v27 }
 0x555   :  { %v680_v59 = vsub.f32 1.0, %v679_v58 }
 0x556   :  { %v719_v9 = vand.u32 2147483648, %v662_v24  ;;  %vm713_vm2 = vweird.f32 %v662_v24  ;;  %v717_v12 = vand.u32 2147483647, %v662_v24 }
 0x557   :  { %v681_v10 = vmul.f32 %v1795_v57, %v680_v59 }
 0x558   :  { %v720_v14 = vor.u32 1.1754944e-38, %v719_v9  ;;  %vm718_vm4 = vcmp.eq.f32.partialorder %v717_v12, 8.507059e+37 }
 0x559   :  { %v682_v11 = vadd.f32 %v1795_v57, %v681_v10 }
 0x55b   :  { %v686_v21 = vsel %vm685_vm14, %v1795_v57, %v682_v11 }
 0x55c   :  { %v691_v25 = vsel %vm688_vm15, %v690_v22, %v686_v21 }
 0x5a5   :  { %v732_v63 = vpop.permute.xlu2 %731 }
 0x5a6   :  { %v2343_v0 = vadd.f32 %v732_v63, %v725_v62  ;;  %v747_v63 = vld [vmem:[#allocation4 + $0x98] sm:$0xff] }
 0x5a8   :  { %1798 = vtanh.f32 %v2343_v0 }
 0x5a9   :  { %1800 = vrcp.f32 %v662_v24 }
 0x5ae   :  { %v1799_v23 = vpop.eup %1798 }
 0x5af   :  { %v741_v52 = vmul.f32 %v1799_v23, %v691_v25  ;;  %v1801_v1 = vpop.eup %1800 }
 0x5b0   :  { %v709_v2 = vmul.f32 %v1801_v1, %v662_v24  ;;  %vm714_vm1 = vweird.f32 %v1801_v1 }
 0x5b1   :  { %750 = vrot.lane.b32.xlu1 %v741_v52, %s2077_s2  ;;  %vm715_vm3 = vmor %vm713_vm2, %vm714_vm1 }
 0x5b2   :  { %v710_v3 = vsub.f32 1.0, %v709_v2 }
 0x5b4   :  { %v711_v4 = vmul.f32 %v1801_v1, %v710_v3 }
 0x5b6   :  { %v712_v8 = vadd.f32 %v1801_v1, %v711_v4 }
 0x5b8   :  { %v716_v13 = vsel %vm715_vm3, %v1801_v1, %v712_v8 }
 0x5b9   :  { %v721_v16 = vsel %vm718_vm4, %v720_v14, %v716_v13 }
 0x5c5   :  { %v734_v6 = vpop.permute.xlu0 %733 }
 0x5c6   :  { %v2348_v7 = vadd.f32 %v734_v6, %v726_v5 }
 0x5c8   :  { %1802 = vtanh.f32 %v2348_v7 }
 0x5ce   :  { %v1803_v15 = vpop.eup %1802 }
 0x5cf   :  { %v742_v17 = vmul.f32 %v1803_v15, %v721_v16 }
 0x5d1   :  { %752 = vrot.lane.b32.xlu2 %v742_v17, %s2077_s2 }
 0x623   :  { %v751_v61 = vpop.permute.xlu1 %750 }
 0x624   :  { %1646 = vmatmul.msk.f32.vlgmr.msra.gmra.mxu0 %vm86_vm0, %v751_v61  ;;  %1648 = vmatmul.msk.f32.vlgmr.msra.gmra.mxu1 %vm86_vm0, %v751_v61 }
 0x625   :  { %1412 = vmatpush.msra.mxu0 %v2354_v26  ;;  %1435 = vmatpush.msra.mxu1 %v1925_v19 }
 0x627   :  { %1413 = vmatpush.msra.mxu0 %v2357_v31  ;;  %1436 = vmatpush.msra.mxu1 %v1927_v28 }
 0x629   :  { %1414 = vmatpush.msra.mxu0 %v2360_v29  ;;  %1437 = vmatpush.msra.mxu1 %v1929_v30 }
 0x62b   :  { %v753_v32 = vpop.permute.xlu2 %752  ;;  %1415 = vmatpush.msra.mxu0 %v2363_v33  ;;  %1438 = vmatpush.msra.mxu1 %v1931_v34 }
 0x62c   :  { %1647 = vmatmul.msk.f32.gmra.mxu0 %vm86_vm0, %v753_v32  ;;  %1649 = vmatmul.msk.f32.gmra.mxu1 %vm86_vm0, %v753_v32 }
 0x62d   :  { %1416 = vmatpush.msra.mxu0 %v2368_v42  ;;  %1439 = vmatpush.msra.mxu1 %v1933_v35 }
 0x62f   :  { %1417 = vmatpush.msra.mxu0 %v2371_v36  ;;  %1440 = vmatpush.msra.mxu1 %v1935_v37 }
 0x631   :  { %1418 = vmatpush.msra.mxu0 %v2374_v38  ;;  %1441 = vmatpush.msra.mxu1 %v1937_v39 }
 0x633   :  { %1419 = vmatpush.msra.mxu0 %v2377_v40  ;;  %1442 = vmatpush.msra.mxu1 %v1939_v41 }
 0x6a1   :  { %v775_v44 = vpop.f32.mrf.mxu0  ;;  %v798_v54 = vpop.f32.mrf.mxu1 }
 0x6a2   :  { %v776_v45 = vadd.f32 %v775_v44, %v744_v43  ;;  %v799_v58 = vadd.f32 %v798_v54, %v745_v55 }
 0x6a4   :  { %v1650_v46 = vmul.f32 -1.442695, %v776_v45  ;;  %v1651_v16 = vmul.f32 -1.442695, %v799_v58 }
 0x6a6   :  { %1804 = vpow2.f32 %v1650_v46 }
 0x6a9   :  { %v778_v48 = vpop.f32.mrf.mxu0  ;;  %v801_v11 = vpop.f32.mrf.mxu1 }
 0x6aa   :  { %v779_v49 = vadd.f32 %v778_v48, %v746_v47  ;;  %v802_v22 = vadd.f32 %v801_v11, %v747_v63 }
 0x6ac   :  { %v1805_v51 = vpop.eup %1804  ;;  %v1652_v50 = vmul.f32 -1.442695, %v779_v49  ;;  %v1653_v17 = vmul.f32 -1.442695, %v802_v22 }
 0x6ad   :  { %v816_v53 = vadd.f32 1.0, %v1805_v51 }
 0x6ae   :  { %1806 = vpow2.f32 %v1652_v50 }
 0x6af   :  { %1808 = vrcp.f32 %v816_v53  ;;  %v831_v62 = vand.u32 2147483648, %v816_v53  ;;  %v829_v20 = vand.u32 2147483647, %v816_v53  ;;  %vm825_vm6 = vweird.f32 %v816_v53 }
 0x6b1   :  { %v832_v23 = vor.u32 1.1754944e-38, %v831_v62  ;;  %vm830_vm8 = vcmp.eq.f32.partialorder %v829_v20, 8.507059e+37 }
 0x6b4   :  { %v1807_v56 = vpop.eup %1806 }
 0x6b5   :  { %v1809_v57 = vpop.eup %1808  ;;  %v818_v59 = vadd.f32 1.0, %v1807_v56 }
 0x6b6   :  { %v821_v60 = vmul.f32 %v1809_v57, %v816_v53  ;;  %vm826_vm5 = vweird.f32 %v1809_v57 }
 0x6b7   :  { %1810 = vrcp.f32 %v818_v59  ;;  %vm827_vm7 = vmor %vm825_vm6, %vm826_vm5  ;;  %v861_v4 = vand.u32 2147483648, %v818_v59  ;;  %v859_v6 = vand.u32 2147483647, %v818_v59  ;;  %vm855_vm10 = vweird.f32 %v818_v59 }
 0x6b8   :  { %v822_v10 = vsub.f32 1.0, %v821_v60  ;;  %1812 = vtanh.f32 %v799_v58 }
 0x6b9   :  { %1814 = vtanh.f32 %v802_v22  ;;  %v862_v9 = vor.u32 1.1754944e-38, %v861_v4  ;;  %vm860_vm12 = vcmp.eq.f32.partialorder %v859_v6, 8.507059e+37  ;;  %v903_v6 = vld [vmem:[#allocation4 + $0xb0] sm:$0xff] }
 0x6ba   :  { %v823_v18 = vmul.f32 %v1809_v57, %v822_v10  ;;  %1816 = vpow2.f32 %v1651_v16 }
 0x6bb   :  { %1818 = vpow2.f32 %v1653_v17  ;;  %v904_v17 = vld [vmem:[#allocation4 + $0xb8] sm:$0xff] }
 0x6bc   :  { %v824_v27 = vadd.f32 %v1809_v57, %v823_v18 }
 0x6bd   :  { %v1811_v21 = vpop.eup %1810 }
 0x6be   :  { %v851_v24 = vmul.f32 %v1811_v21, %v818_v59  ;;  %v828_v25 = vsel %vm827_vm7, %v1809_v57, %v824_v27  ;;  %v1813_v52 = vpop.eup %1812  ;;  %vm856_vm9 = vweird.f32 %v1811_v21 }
 0x6bf   :  { %v833_v1 = vsel %vm830_vm8, %v832_v23, %v828_v25  ;;  %vm857_vm11 = vmor %vm855_vm10, %vm856_vm9  ;;  %v1815_v13 = vpop.eup %1814 }
 0x6c0   :  { %v884_v2 = vmul.f32 %v1813_v52, %v833_v1  ;;  %v852_v3 = vsub.f32 1.0, %v851_v24  ;;  %v1817_v61 = vpop.eup %1816  ;;  %v882_v43 = vmul.f32 %v833_v1, %v2343_v0 }
 0x6c1   :  { %v817_v19 = vadd.f32 1.0, %v1817_v61  ;;  %v1819_v28 = vpop.eup %1818 }
 0x6c2   :  { %888 = vrot.lane.b32.xlu0 %v884_v2, %s2077_s2  ;;  %v853_v5 = vmul.f32 %v1811_v21, %v852_v3  ;;  %v819_v30 = vadd.f32 1.0, %v1819_v28 }
 0x6c3   :  { %1820 = vrcp.f32 %v817_v19  ;;  %v846_v48 = vand.u32 2147483648, %v817_v19  ;;  %vm840_vm14 = vweird.f32 %v817_v19  ;;  %v844_v49 = vand.u32 2147483647, %v817_v19 }
 0x6c4   :  { %v854_v8 = vadd.f32 %v1811_v21, %v853_v5  ;;  %1822 = vrcp.f32 %v819_v30  ;;  %v876_v60 = vand.u32 2147483648, %v819_v30  ;;  %vm870_vm3 = vweird.f32 %v819_v30 }
 0x6c5   :  { %v847_v54 = vor.u32 1.1754944e-38, %v846_v48  ;;  %vm845_vm1 = vcmp.eq.f32.partialorder %v844_v49, 8.507059e+37  ;;  %v874_v10 = vand.u32 2147483647, %v819_v30 }
 0x6c6   :  { %v858_v12 = vsel %vm857_vm11, %v1811_v21, %v854_v8 }
 0x6c7   :  { %v863_v14 = vsel %vm860_vm12, %v862_v9, %v858_v12  ;;  %vm875_vm5 = vcmp.eq.f32.partialorder %v874_v10, 8.507059e+37 }
 0x6c8   :  { %v885_v15 = vmul.f32 %v1815_v13, %v863_v14  ;;  %v883_v53 = vmul.f32 %v863_v14, %v2348_v7  ;;  %v877_v7 = vor.u32 1.1754944e-38, %v876_v60 }
 0x6c9   :  { %v1821_v32 = vpop.eup %1820 }
 0x6ca   :  { %890 = vrot.lane.b32.xlu1 %v885_v15, %s2077_s2  ;;  %v836_v34 = vmul.f32 %v1821_v32, %v817_v19  ;;  %v1823_v37 = vpop.eup %1822  ;;  %vm841_vm13 = vweird.f32 %v1821_v32 }
 0x6cb   :  { %v866_v41 = vmul.f32 %v1823_v37, %v819_v30  ;;  %vm842_vm15 = vmor %vm840_vm14, %vm841_vm13  ;;  %vm871_vm2 = vweird.f32 %v1823_v37 }
 0x6cc   :  { %v837_v35 = vsub.f32 1.0, %v836_v34  ;;  %vm872_vm4 = vmor %vm870_vm3, %vm871_vm2 }
 0x6cd   :  { %v867_v47 = vsub.f32 1.0, %v866_v41 }
 0x6ce   :  { %v838_v39 = vmul.f32 %v1821_v32, %v837_v35 }
 0x6cf   :  { %v868_v50 = vmul.f32 %v1823_v37, %v867_v47 }
 0x6d0   :  { %v839_v46 = vadd.f32 %v1821_v32, %v838_v39 }
 0x6d1   :  { %v869_v59 = vadd.f32 %v1823_v37, %v868_v50 }
 0x6d2   :  { %v843_v51 = vsel %vm842_vm15, %v1821_v32, %v839_v46 }
 0x6d3   :  { %v848_v57 = vsel %vm845_vm1, %v847_v54, %v843_v51  ;;  %v873_v62 = vsel %vm872_vm4, %v1823_v37, %v869_v59 }
 0x6d4   :  { %v878_v11 = vsel %vm875_vm5, %v877_v7, %v873_v62 }
 0x734   :  { %v889_v44 = vpop.permute.xlu0 %888 }
 0x735   :  { %v2383_v45 = vadd.f32 %v889_v44, %v882_v43 }
 0x737   :  { %1824 = vtanh.f32 %v2383_v45 }
 0x73c   :  { %v891_v55 = vpop.permute.xlu1 %890 }
 0x73d   :  { %v1825_v0 = vpop.eup %1824  ;;  %v2387_v56 = vadd.f32 %v891_v55, %v883_v53 }
 0x73e   :  { %v898_v58 = vmul.f32 %v1825_v0, %v848_v57 }
 0x73f   :  { %1826 = vtanh.f32 %v2387_v56 }
 0x740   :  { %907 = vrot.lane.b32.xlu2 %v898_v58, %s2077_s2 }
 0x745   :  { %v1827_v63 = vpop.eup %1826 }
 0x746   :  { %v899_v18 = vmul.f32 %v1827_v63, %v878_v11 }
 0x748   :  { %909 = vrot.lane.b32.xlu0 %v899_v18, %s2077_s2 }
 0x79a   :  { %v908_v20 = vpop.permute.xlu2 %907 }
 0x79b   :  { %1654 = vmatmul.msk.f32.vlgmr.msra.gmra.mxu2 %vm86_vm0, %v908_v20  ;;  %1656 = vmatmul.msk.f32.vlgmr.msra.gmra.mxu3 %vm86_vm0, %v908_v20 }
 0x79c   :  { %1688 = vmatpush.msra.mxu3 %v2354_v26  ;;  %v901_v26 = vld [vmem:[#allocation4 + $0xa0] sm:$0xff] }
 0x79e   :  { %1689 = vmatpush.msra.mxu3 %v2357_v31 }
 0x7a0   :  { %1690 = vmatpush.msra.mxu3 %v2360_v29 }
 0x7a2   :  { %1691 = vmatpush.msra.mxu3 %v2363_v33 }
 0x7a4   :  { %1692 = vmatpush.msra.mxu3 %v2368_v42  ;;  %v902_v42 = vld [vmem:[#allocation4 + $0xa8] sm:$0xff] }
 0x7a6   :  { %1693 = vmatpush.msra.mxu3 %v2371_v36 }
 0x7a8   :  { %1694 = vmatpush.msra.mxu3 %v2374_v38 }
 0x7aa   :  { %1695 = vmatpush.msra.mxu3 %v2377_v40 }
 0x7ba   :  { %v910_v27 = vpop.permute.xlu0 %909 }
 0x7bb   :  { %1655 = vmatmul.msk.f32.gmra.mxu2 %vm86_vm0, %v910_v27  ;;  %1657 = vmatmul.msk.f32.gmra.mxu3 %vm86_vm0, %v910_v27 }
 0x81e   :  { %v932_v21 = vpop.f32.mrf.mxu2  ;;  %v955_v23 = vpop.f32.mrf.mxu3 }
 0x81f   :  { %v933_v31 = vadd.f32 %v932_v21, %v901_v26  ;;  %v956_v24 = vadd.f32 %v955_v23, %v902_v42 }
 0x821   :  { %v1658_v22 = vmul.f32 -1.442695, %v933_v31  ;;  %v1659_v48 = vmul.f32 -1.442695, %v956_v24 }
 0x823   :  { %1828 = vpow2.f32 %v1658_v22 }
 0x829   :  { %v1829_v29 = vpop.eup %1828 }
 0x82a   :  { %v973_v33 = vadd.f32 1.0, %v1829_v29 }
 0x82c   :  { %1830 = vrcp.f32 %v973_v33  ;;  %v988_v40 = vand.u32 2147483648, %v973_v33  ;;  %v986_v1 = vand.u32 2147483647, %v973_v33  ;;  %vm982_vm7 = vweird.f32 %v973_v33 }
 0x82d   :  { %1832 = vtanh.f32 %v956_v24 }
 0x82e   :  { %v989_v3 = vor.u32 1.1754944e-38, %v988_v40  ;;  %vm987_vm9 = vcmp.eq.f32.partialorder %v986_v1, 8.507059e+37 }
 0x832   :  { %v1831_v36 = vpop.eup %1830 }
 0x833   :  { %v978_v38 = vmul.f32 %v1831_v36, %v973_v33  ;;  %vm983_vm6 = vweird.f32 %v1831_v36  ;;  %v1833_v5 = vpop.eup %1832 }
 0x834   :  { %vm984_vm8 = vmor %vm982_vm7, %vm983_vm6 }
 0x835   :  { %v979_v25 = vsub.f32 1.0, %v978_v38 }
 0x837   :  { %v980_v52 = vmul.f32 %v1831_v36, %v979_v25 }
 0x839   :  { %v981_v2 = vadd.f32 %v1831_v36, %v980_v52 }
 0x83b   :  { %v985_v4 = vsel %vm984_vm8, %v1831_v36, %v981_v2 }
 0x83c   :  { %v990_v8 = vsel %vm987_vm9, %v989_v3, %v985_v4  ;;  %v1058_v3 = vld [vmem:[#allocation4 + $0xc0] sm:$0xff] }
 0x83d   :  { %v1041_v9 = vmul.f32 %v1833_v5, %v990_v8  ;;  %v1039_v10 = vmul.f32 %v990_v8, %v2383_v45  ;;  %v1060_v8 = vld [vmem:[#allocation4 + $0xd0] sm:$0xff] }
 0x83e   :  { %v935_v12 = vpop.f32.mrf.mxu2  ;;  %v958_v61 = vpop.f32.mrf.mxu3 }
 0x83f   :  { %v936_v13 = vadd.f32 %v935_v12, %v903_v6  ;;  %1045 = vrot.lane.b32.xlu1 %v1041_v9, %s2077_s2  ;;  %v959_v28 = vadd.f32 %v958_v61, %v904_v17  ;;  %v1059_v17 = vld [vmem:[#allocation4 + $0xc8] sm:$0xff] }
 0x841   :  { %v1660_v14 = vmul.f32 -1.442695, %v936_v13  ;;  %v1661_v49 = vmul.f32 -1.442695, %v959_v28 }
 0x843   :  { %1834 = vpow2.f32 %v1660_v14 }
 0x849   :  { %v1835_v15 = vpop.eup %1834 }
 0x84a   :  { %v975_v16 = vadd.f32 1.0, %v1835_v15 }
 0x84c   :  { %1836 = vrcp.f32 %v975_v16  ;;  %v1018_v34 = vand.u32 2147483648, %v975_v16  ;;  %v1016_v37 = vand.u32 2147483647, %v975_v16  ;;  %vm1012_vm11 = vweird.f32 %v975_v16 }
 0x84d   :  { %1838 = vtanh.f32 %v959_v28 }
 0x84e   :  { %v1019_v41 = vor.u32 1.1754944e-38, %v1018_v34  ;;  %vm1017_vm13 = vcmp.eq.f32.partialorder %v1016_v37, 8.507059e+37  ;;  %1840 = vpow2.f32 %v1659_v48  ;;  %v1061_v37 = vld [vmem:[#allocation4 + $0xd8] sm:$0xff] }
 0x84f   :  { %1842 = vpow2.f32 %v1661_v49 }
 0x852   :  { %v1837_v19 = vpop.eup %1836 }
 0x853   :  { %v1008_v30 = vmul.f32 %v1837_v19, %v975_v16  ;;  %vm1013_vm10 = vweird.f32 %v1837_v19  ;;  %v1839_v44 = vpop.eup %1838 }
 0x854   :  { %vm1014_vm12 = vmor %vm1012_vm11, %vm1013_vm10  ;;  %v1841_v51 = vpop.eup %1840 }
 0x855   :  { %v1009_v32 = vsub.f32 1.0, %v1008_v30  ;;  %v974_v50 = vadd.f32 1.0, %v1841_v51  ;;  %v1843_v53 = vpop.eup %1842 }
 0x856   :  { %v976_v54 = vadd.f32 1.0, %v1843_v53 }
 0x857   :  { %v1010_v35 = vmul.f32 %v1837_v19, %v1009_v32  ;;  %1844 = vrcp.f32 %v974_v50  ;;  %v1003_v18 = vand.u32 2147483648, %v974_v50  ;;  %vm997_vm15 = vweird.f32 %v974_v50 }
 0x858   :  { %1846 = vrcp.f32 %v976_v54  ;;  %v1001_v20 = vand.u32 2147483647, %v974_v50  ;;  %v1033_v36 = vand.u32 2147483648, %v976_v54  ;;  %vm1027_vm4 = vweird.f32 %v976_v54 }
 0x859   :  { %v1011_v39 = vadd.f32 %v1837_v19, %v1010_v35  ;;  %v1004_v31 = vor.u32 1.1754944e-38, %v1003_v18  ;;  %v1031_v24 = vand.u32 2147483647, %v976_v54 }
 0x85a   :  { %vm1002_vm2 = vcmp.eq.f32.partialorder %v1001_v20, 8.507059e+37 }
 0x85b   :  { %v1015_v43 = vsel %vm1014_vm12, %v1837_v19, %v1011_v39  ;;  %vm1032_vm6 = vcmp.eq.f32.partialorder %v1031_v24, 8.507059e+37 }
 0x85c   :  { %v1020_v46 = vsel %vm1017_vm13, %v1019_v41, %v1015_v43 }
 0x85d   :  { %v1042_v47 = vmul.f32 %v1839_v44, %v1020_v46  ;;  %v1845_v55 = vpop.eup %1844  ;;  %v1040_v21 = vmul.f32 %v1020_v46, %v2387_v56  ;;  %v1034_v56 = vor.u32 1.1754944e-38, %v1033_v36 }
 0x85e   :  { %v993_v0 = vmul.f32 %v1845_v55, %v974_v50  ;;  %v1847_v58 = vpop.eup %1846  ;;  %vm998_vm14 = vweird.f32 %v1845_v55 }
 0x85f   :  { %1047 = vrot.lane.b32.xlu2 %v1042_v47, %s2077_s2  ;;  %v1023_v60 = vmul.f32 %v1847_v58, %v976_v54  ;;  %vm999_vm1 = vmor %vm997_vm15, %vm998_vm14  ;;  %vm1028_vm3 = vweird.f32 %v1847_v58 }
 0x860   :  { %v994_v57 = vsub.f32 1.0, %v993_v0  ;;  %vm1029_vm5 = vmor %vm1027_vm4, %vm1028_vm3 }
 0x861   :  { %v1024_v11 = vsub.f32 1.0, %v1023_v60 }
 0x862   :  { %v995_v59 = vmul.f32 %v1845_v55, %v994_v57 }
 0x863   :  { %v1025_v26 = vmul.f32 %v1847_v58, %v1024_v11 }
 0x864   :  { %v996_v63 = vadd.f32 %v1845_v55, %v995_v59 }
 0x865   :  { %v1026_v23 = vadd.f32 %v1847_v58, %v1025_v26 }
 0x866   :  { %v1000_v27 = vsel %vm999_vm1, %v1845_v55, %v996_v63 }
 0x867   :  { %v1005_v33 = vsel %vm1002_vm2, %v1004_v31, %v1000_v27  ;;  %v1030_v38 = vsel %vm1029_vm5, %v1847_v58, %v1026_v23 }
 0x868   :  { %v1035_v40 = vsel %vm1032_vm6, %v1034_v56, %v1030_v38 }
 0x8b1   :  { %v1046_v62 = vpop.permute.xlu1 %1045 }
 0x8b2   :  { %v2407_v7 = vadd.f32 %v1046_v62, %v1039_v10 }
 0x8b4   :  { %1848 = vtanh.f32 %v2407_v7 }
 0x8b9   :  { %v1048_v22 = vpop.permute.xlu2 %1047 }
 0x8ba   :  { %v1849_v45 = vpop.eup %1848  ;;  %v2411_v29 = vadd.f32 %v1048_v22, %v1040_v21 }
 0x8bb   :  { %v1055_v42 = vmul.f32 %v1849_v45, %v1005_v33 }
 0x8bc   :  { %1850 = vtanh.f32 %v2411_v29 }
 0x8bd   :  { %1064 = vrot.lane.b32.xlu0 %v1055_v42, %s2077_s2 }
 0x8c2   :  { %v1851_v25 = vpop.eup %1850 }
 0x8c3   :  { %v1056_v52 = vmul.f32 %v1851_v25, %v1035_v40 }
 0x8c5   :  { %1066 = vrot.lane.b32.xlu1 %v1056_v52, %s2077_s2 }
 0x92f   :  { %v1065_v1 = vpop.permute.xlu0 %1064 }
 0x930   :  { %1662 = vmatmul.msk.f32.vlgmr.msrb.gmra.mxu0 %vm86_vm0, %v1065_v1  ;;  %1664 = vmatmul.msk.f32.vlgmr.msrb.gmra.mxu1 %vm86_vm0, %v1065_v1 }
 0x937   :  { %v1067_v2 = vpop.permute.xlu1 %1066 }
 0x938   :  { %1663 = vmatmul.msk.f32.gmra.mxu0 %vm86_vm0, %v1067_v2  ;;  %1665 = vmatmul.msk.f32.gmra.mxu1 %vm86_vm0, %v1067_v2 }
 0x9ad   :  { %v1089_v4 = vpop.f32.mrf.mxu0  ;;  %v1112_v16 = vpop.f32.mrf.mxu1 }
 0x9ae   :  { %v1090_v5 = vadd.f32 %v1089_v4, %v1058_v3  ;;  %v1113_v28 = vadd.f32 %v1112_v16, %v1059_v17 }
 0x9b0   :  { %v1666_v6 = vmul.f32 -1.442695, %v1090_v5  ;;  %v1667_v18 = vmul.f32 -1.442695, %v1113_v28 }
 0x9b2   :  { %1852 = vpow2.f32 %v1666_v6 }
 0x9b5   :  { %v1092_v9 = vpop.f32.mrf.mxu0  ;;  %v1115_v39 = vpop.f32.mrf.mxu1 }
 0x9b6   :  { %v1093_v12 = vadd.f32 %v1092_v9, %v1060_v8  ;;  %v1116_v47 = vadd.f32 %v1115_v39, %v1061_v37  ;;  %v1217_v39 = vld [vmem:[#allocation4 + $0xf0] sm:$0xff] }
 0x9b8   :  { %v1853_v13 = vpop.eup %1852  ;;  %v1668_v14 = vmul.f32 -1.442695, %v1093_v12  ;;  %v1669_v22 = vmul.f32 -1.442695, %v1116_v47 }
 0x9b9   :  { %v1130_v15 = vadd.f32 1.0, %v1853_v13 }
 0x9ba   :  { %1854 = vpow2.f32 %v1668_v14 }
 0x9bb   :  { %1856 = vrcp.f32 %v1130_v15  ;;  %v1145_v35 = vand.u32 2147483648, %v1130_v15  ;;  %v1143_v43 = vand.u32 2147483647, %v1130_v15  ;;  %vm1139_vm8 = vweird.f32 %v1130_v15 }
 0x9bd   :  { %v1146_v48 = vor.u32 1.1754944e-38, %v1145_v35  ;;  %vm1144_vm10 = vcmp.eq.f32.partialorder %v1143_v43, 8.507059e+37 }
 0x9c0   :  { %v1855_v61 = vpop.eup %1854 }
 0x9c1   :  { %v1857_v19 = vpop.eup %1856  ;;  %v1132_v30 = vadd.f32 1.0, %v1855_v61 }
 0x9c2   :  { %v1135_v32 = vmul.f32 %v1857_v19, %v1130_v15  ;;  %vm1140_vm7 = vweird.f32 %v1857_v19 }
 0x9c3   :  { %1858 = vrcp.f32 %v1132_v30  ;;  %vm1141_vm9 = vmor %vm1139_vm8, %vm1140_vm7  ;;  %v1175_v0 = vand.u32 2147483648, %v1132_v30  ;;  %v1173_v58 = vand.u32 2147483647, %v1132_v30  ;;  %vm1169_vm12 = vweird.f32 %v1132_v30 }
 0x9c4   :  { %v1136_v34 = vsub.f32 1.0, %v1135_v32  ;;  %1860 = vtanh.f32 %v1113_v28  ;;  %v1215_v32 = vld [vmem:[#allocation4 + $0xe0] sm:$0xff] }
 0x9c5   :  { %1862 = vtanh.f32 %v1116_v47  ;;  %v1176_v60 = vor.u32 1.1754944e-38, %v1175_v0  ;;  %vm1174_vm14 = vcmp.eq.f32.partialorder %v1173_v58, 8.507059e+37  ;;  %v1218_v58 = vld [vmem:[#allocation4 + $0xf8] sm:$0xff] }
 0x9c6   :  { %v1137_v41 = vmul.f32 %v1857_v19, %v1136_v34  ;;  %1864 = vpow2.f32 %v1667_v18 }
 0x9c8   :  { %v1138_v44 = vadd.f32 %v1857_v19, %v1137_v41 }
 0x9c9   :  { %v1859_v46 = vpop.eup %1858 }
 0x9ca   :  { %v1165_v49 = vmul.f32 %v1859_v46, %v1132_v30  ;;  %v1142_v51 = vsel %vm1141_vm9, %v1857_v19, %v1138_v44  ;;  %v1861_v50 = vpop.eup %1860  ;;  %vm1170_vm11 = vweird.f32 %v1859_v46 }
 0x9cb   :  { %v1147_v53 = vsel %vm1144_vm10, %v1146_v48, %v1142_v51  ;;  %vm1171_vm13 = vmor %vm1169_vm12, %vm1170_vm11  ;;  %v1863_v62 = vpop.eup %1862 }
 0x9cc   :  { %v1198_v54 = vmul.f32 %v1861_v50, %v1147_v53  ;;  %v1166_v55 = vsub.f32 1.0, %v1165_v49  ;;  %v1865_v20 = vpop.eup %1864  ;;  %v1196_v33 = vmul.f32 %v1147_v53, %v2407_v7  ;;  %v1216_v49 = vld [vmem:[#allocation4 + $0xe8] sm:$0xff] }
 0x9cd   :  { %v1131_v27 = vadd.f32 1.0, %v1865_v20 }
 0x9ce   :  { %1202 = vrot.lane.b32.xlu2 %v1198_v54, %s2077_s2  ;;  %v1167_v57 = vmul.f32 %v1859_v46, %v1166_v55 }
 0x9cf   :  { %1866 = vrcp.f32 %v1131_v27  ;;  %v1160_v24 = vand.u32 2147483648, %v1131_v27  ;;  %vm1154_vm1 = vweird.f32 %v1131_v27  ;;  %v1158_v38 = vand.u32 2147483647, %v1131_v27 }
 0x9d0   :  { %v1168_v59 = vadd.f32 %v1859_v46, %v1167_v57  ;;  %1868 = vpow2.f32 %v1669_v22 }
 0x9d1   :  { %v1161_v40 = vor.u32 1.1754944e-38, %v1160_v24  ;;  %vm1159_vm3 = vcmp.eq.f32.partialorder %v1158_v38, 8.507059e+37 }
 0x9d2   :  { %v1172_v10 = vsel %vm1171_vm13, %v1859_v46, %v1168_v59 }
 0x9d3   :  { %v1177_v63 = vsel %vm1174_vm14, %v1176_v60, %v1172_v10 }
 0x9d4   :  { %v1199_v11 = vmul.f32 %v1863_v62, %v1177_v63  ;;  %v1197_v8 = vmul.f32 %v1177_v63, %v2411_v29 }
 0x9d5   :  { %v1867_v26 = vpop.eup %1866 }
 0x9d6   :  { %1204 = vrot.lane.b32.xlu0 %v1199_v11, %s2077_s2  ;;  %v1150_v21 = vmul.f32 %v1867_v26, %v1131_v27  ;;  %vm1155_vm15 = vweird.f32 %v1867_v26  ;;  %v1869_v56 = vpop.eup %1868 }
 0x9d7   :  { %vm1156_vm2 = vmor %vm1154_vm1, %vm1155_vm15  ;;  %v1133_v1 = vadd.f32 1.0, %v1869_v56 }
 0x9d8   :  { %v1151_v31 = vsub.f32 1.0, %v1150_v21 }
 0x9d9   :  { %v1190_v14 = vand.u32 2147483648, %v1133_v1  ;;  %vm1184_vm5 = vweird.f32 %v1133_v1  ;;  %v1188_v15 = vand.u32 2147483647, %v1133_v1 }
 0x9da   :  { %v1152_v45 = vmul.f32 %v1867_v26, %v1151_v31 }
 0x9db   :  { %v1191_v17 = vor.u32 1.1754944e-38, %v1190_v14  ;;  %vm1189_vm7 = vcmp.eq.f32.partialorder %v1188_v15, 8.507059e+37 }
 0x9dc   :  { %v1153_v36 = vadd.f32 %v1867_v26, %v1152_v45 }
 0x9de   :  { %v1157_v25 = vsel %vm1156_vm2, %v1867_v26, %v1153_v36 }
 0x9df   :  { %v1162_v2 = vsel %vm1159_vm3, %v1161_v40, %v1157_v25 }
 0xa28   :  { %v1203_v42 = vpop.permute.xlu2 %1202 }
 0xa29   :  { %v2423_v23 = vadd.f32 %v1203_v42, %v1196_v33 }
 0xa2b   :  { %1870 = vtanh.f32 %v2423_v23 }
 0xa2c   :  { %1872 = vrcp.f32 %v1133_v1 }
 0xa31   :  { %v1871_v52 = vpop.eup %1870 }
 0xa32   :  { %v1212_v7 = vmul.f32 %v1871_v52, %v1162_v2  ;;  %v1873_v3 = vpop.eup %1872 }
 0xa33   :  { %v1180_v4 = vmul.f32 %v1873_v3, %v1133_v1  ;;  %vm1185_vm4 = vweird.f32 %v1873_v3 }
 0xa34   :  { %1221 = vrot.lane.b32.xlu1 %v1212_v7, %s2077_s2  ;;  %vm1186_vm6 = vmor %vm1184_vm5, %vm1185_vm4 }
 0xa35   :  { %v1181_v5 = vsub.f32 1.0, %v1180_v4 }
 0xa37   :  { %v1182_v6 = vmul.f32 %v1873_v3, %v1181_v5 }
 0xa39   :  { %v1183_v13 = vadd.f32 %v1873_v3, %v1182_v6 }
 0xa3b   :  { %v1187_v16 = vsel %vm1186_vm6, %v1873_v3, %v1183_v13 }
 0xa3c   :  { %v1192_v19 = vsel %vm1189_vm7, %v1191_v17, %v1187_v16 }
 0xa48   :  { %v1205_v9 = vpop.permute.xlu0 %1204 }
 0xa49   :  { %v2428_v12 = vadd.f32 %v1205_v9, %v1197_v8 }
 0xa4b   :  { %1874 = vtanh.f32 %v2428_v12 }
 0xa51   :  { %v1875_v61 = vpop.eup %1874 }
 0xa52   :  { %v1213_v28 = vmul.f32 %v1875_v61, %v1192_v19 }
 0xa54   :  { %1223 = vrot.lane.b32.xlu2 %v1213_v28, %s2077_s2 }
 0xaa6   :  { %v1222_v29 = vpop.permute.xlu1 %1221 }
 0xaa7   :  { %1670 = vmatmul.msk.f32.vlgmr.msrb.gmra.mxu2 %vm86_vm0, %v1222_v29  ;;  %1672 = vmatmul.msk.f32.vlgmr.msrb.gmra.mxu3 %vm86_vm0, %v1222_v29 }
 0xaae   :  { %v1224_v30 = vpop.permute.xlu2 %1223 }
 0xaaf   :  { %1671 = vmatmul.msk.f32.gmra.mxu2 %vm86_vm0, %v1224_v30  ;;  %1673 = vmatmul.msk.f32.gmra.mxu3 %vm86_vm0, %v1224_v30 }
 0xb2a   :  { %v1246_v34 = vpop.f32.mrf.mxu2  ;;  %v1269_v48 = vpop.f32.mrf.mxu3 }
 0xb2b   :  { %v1247_v35 = vadd.f32 %v1246_v34, %v1215_v32  ;;  %v1270_v53 = vadd.f32 %v1269_v48, %v1216_v49 }
 0xb2d   :  { %v1674_v37 = vmul.f32 -1.442695, %v1247_v35  ;;  %v1675_v52 = vmul.f32 -1.442695, %v1270_v53 }
 0xb2f   :  { %1876 = vpow2.f32 %v1674_v37 }
 0xb32   :  { %v1249_v41 = vpop.f32.mrf.mxu2  ;;  %v1272_v59 = vpop.f32.mrf.mxu3 }
 0xb33   :  { %v1250_v43 = vadd.f32 %v1249_v41, %v1217_v39  ;;  %v1273_v11 = vadd.f32 %v1272_v59, %v1218_v58 }
 0xb35   :  { %v1877_v44 = vpop.eup %1876  ;;  %v1676_v46 = vmul.f32 -1.442695, %v1250_v43  ;;  %v1677_v1 = vmul.f32 -1.442695, %v1273_v11 }
 0xb36   :  { %v1287_v47 = vadd.f32 1.0, %v1877_v44 }
 0xb37   :  { %1878 = vpow2.f32 %v1676_v46 }
 0xb38   :  { %1880 = vrcp.f32 %v1287_v47  ;;  %v1302_v57 = vand.u32 2147483648, %v1287_v47  ;;  %v1300_v10 = vand.u32 2147483647, %v1287_v47  ;;  %vm1296_vm9 = vweird.f32 %v1287_v47 }
 0xb3a   :  { %v1303_v18 = vor.u32 1.1754944e-38, %v1302_v57  ;;  %vm1301_vm11 = vcmp.eq.f32.partialorder %v1300_v10, 8.507059e+37 }
 0xb3d   :  { %v1879_v51 = vpop.eup %1878 }
 0xb3e   :  { %v1881_v50 = vpop.eup %1880  ;;  %v1289_v54 = vadd.f32 1.0, %v1879_v51 }
 0xb3f   :  { %v1292_v55 = vmul.f32 %v1881_v50, %v1287_v47  ;;  %vm1297_vm8 = vweird.f32 %v1881_v50 }
 0xb40   :  { %1882 = vrcp.f32 %v1289_v54  ;;  %vm1298_vm10 = vmor %vm1296_vm9, %vm1297_vm8  ;;  %v1332_v45 = vand.u32 2147483648, %v1289_v54  ;;  %v1330_v42 = vand.u32 2147483647, %v1289_v54  ;;  %vm1326_vm13 = vweird.f32 %v1289_v54 }
 0xb41   :  { %v1293_v0 = vsub.f32 1.0, %v1292_v55  ;;  %1884 = vtanh.f32 %v1270_v53  ;;  %v1394_v55 = vld [vmem:[#allocation9] sm:$0x3] }
 0xb42   :  { %1886 = vtanh.f32 %v1273_v11  ;;  %v1333_v24 = vor.u32 1.1754944e-38, %v1332_v45  ;;  %vm1331_vm15 = vcmp.eq.f32.partialorder %v1330_v42, 8.507059e+37 }
 0xb43   :  { %v1294_v60 = vmul.f32 %v1881_v50, %v1293_v0  ;;  %1888 = vpow2.f32 %v1675_v52  ;;  %v1396_v0 = vperm.slane %v1394_v55, 0 }
 0xb44   :  { %1890 = vpow2.f32 %v1677_v1 }
 0xb45   :  { %v1295_v62 = vadd.f32 %v1881_v50, %v1294_v60 }
 0xb46   :  { %v1883_v63 = vpop.eup %1882 }
 0xb47   :  { %v1322_v20 = vmul.f32 %v1883_v63, %v1289_v54  ;;  %v1299_v27 = vsel %vm1298_vm10, %v1881_v50, %v1295_v62  ;;  %v1885_v26 = vpop.eup %1884  ;;  %vm1327_vm12 = vweird.f32 %v1883_v63  ;;  %v1397_v62 = vperm.slane %v1394_v55, 1 }
 0xb48   :  { %v1304_v21 = vsel %vm1301_vm11, %v1303_v18, %v1299_v27  ;;  %vm1328_vm14 = vmor %vm1326_vm13, %vm1327_vm12  ;;  %v1887_v56 = vpop.eup %1886 }
 0xb49   :  { %v1355_v31 = vmul.f32 %v1885_v26, %v1304_v21  ;;  %v1323_v22 = vsub.f32 1.0, %v1322_v20  ;;  %v1889_v2 = vpop.eup %1888  ;;  %v1353_v15 = vmul.f32 %v1304_v21, %v2423_v23 }
 0xb4a   :  { %v1288_v7 = vadd.f32 1.0, %v1889_v2  ;;  %v1891_v3 = vpop.eup %1890 }
 0xb4b   :  { %1359 = vrot.lane.b32.xlu0 %v1355_v31, %s2077_s2  ;;  %v1324_v33 = vmul.f32 %v1883_v63, %v1323_v22  ;;  %v1290_v4 = vadd.f32 1.0, %v1891_v3 }
 0xb4c   :  { %1892 = vrcp.f32 %v1288_v7  ;;  %v1317_v28 = vand.u32 2147483648, %v1288_v7  ;;  %vm1311_vm2 = vweird.f32 %v1288_v7  ;;  %v1315_v29 = vand.u32 2147483647, %v1288_v7 }
 0xb4d   :  { %v1325_v36 = vadd.f32 %v1883_v63, %v1324_v33  ;;  %1894 = vrcp.f32 %v1290_v4  ;;  %v1347_v46 = vand.u32 2147483648, %v1290_v4  ;;  %vm1341_vm6 = vweird.f32 %v1290_v4 }
 0xb4e   :  { %v1318_v35 = vor.u32 1.1754944e-38, %v1317_v28  ;;  %vm1316_vm4 = vcmp.eq.f32.partialorder %v1315_v29, 8.507059e+37  ;;  %v1345_v47 = vand.u32 2147483647, %v1290_v4 }
 0xb4f   :  { %v1329_v38 = vsel %vm1328_vm14, %v1883_v63, %v1325_v36 }
 0xb50   :  { %v1334_v25 = vsel %vm1331_vm15, %v1333_v24, %v1329_v38  ;;  %vm1346_vm8 = vcmp.eq.f32.partialorder %v1345_v47, 8.507059e+37  ;;  %v1550_v47 = vld [vmem:[#allocation10 + $0x20] sm:$0xff] }
 0xb51   :  { %v1356_v40 = vmul.f32 %v1887_v56, %v1334_v25  ;;  %v1354_v34 = vmul.f32 %v1334_v25, %v2428_v12  ;;  %v1348_v12 = vor.u32 1.1754944e-38, %v1347_v46 }
 0xb52   :  { %v1893_v5 = vpop.eup %1892 }
 0xb53   :  { %1361 = vrot.lane.b32.xlu1 %v1356_v40, %s2077_s2  ;;  %v1307_v6 = vmul.f32 %v1893_v5, %v1288_v7  ;;  %v1895_v9 = vpop.eup %1894  ;;  %vm1312_vm1 = vweird.f32 %v1893_v5 }
 0xb54   :  { %v1337_v14 = vmul.f32 %v1895_v9, %v1290_v4  ;;  %vm1313_vm3 = vmor %vm1311_vm2, %vm1312_vm1  ;;  %vm1342_vm5 = vweird.f32 %v1895_v9 }
 0xb55   :  { %v1308_v8 = vsub.f32 1.0, %v1307_v6  ;;  %vm1343_vm7 = vmor %vm1341_vm6, %vm1342_vm5 }
 0xb56   :  { %v1338_v19 = vsub.f32 1.0, %v1337_v14 }
 0xb57   :  { %v1309_v13 = vmul.f32 %v1893_v5, %v1308_v8 }
 0xb58   :  { %v1339_v32 = vmul.f32 %v1895_v9, %v1338_v19 }
 0xb59   :  { %v1310_v61 = vadd.f32 %v1893_v5, %v1309_v13 }
 0xb5a   :  { %v1340_v44 = vadd.f32 %v1895_v9, %v1339_v32 }
 0xb5b   :  { %v1314_v30 = vsel %vm1313_vm3, %v1893_v5, %v1310_v61 }
 0xb5c   :  { %v1319_v41 = vsel %vm1316_vm4, %v1318_v35, %v1314_v30  ;;  %v1344_v48 = vsel %vm1343_vm7, %v1895_v9, %v1340_v44  ;;  %v1551_v44 = vld [vmem:[#allocation10 + $0x28] sm:$0xff] }
 0xb5d   :  { %v1349_v51 = vsel %vm1346_vm8, %v1348_v12, %v1344_v48 }
 0xbbd   :  { %v1360_v16 = vpop.permute.xlu0 %1359 }
 0xbbe   :  { %v2439_v17 = vadd.f32 %v1360_v16, %v1353_v15 }
 0xbc0   :  { %1896 = vtanh.f32 %v2439_v17 }
 0xbc5   :  { %v1362_v37 = vpop.permute.xlu1 %1361 }
 0xbc6   :  { %v1897_v23 = vpop.eup %1896  ;;  %v2443_v39 = vadd.f32 %v1362_v37, %v1354_v34 }
 0xbc7   :  { %v1369_v43 = vmul.f32 %v1897_v23, %v1319_v41  ;;  %v1553_v41 = vld [vmem:[#allocation10 + $0x38] sm:$0xff] }
 0xbc8   :  { %1898 = vtanh.f32 %v2443_v39  ;;  %1576 = vmatpush.msra.mxu2 %v1553_v41 }
 0xbc9   :  { %1373 = vrot.lane.b32.xlu2 %v1369_v43, %s2077_s2  ;;  %v1552_v43 = vld [vmem:[#allocation10 + $0x30] sm:$0xff] }
 0xbca   :  { %1577 = vmatpush.msra.mxu2 %v1552_v43 }
 0xbcc   :  { %1578 = vmatpush.msra.mxu2 %v1551_v44 }
 0xbce   :  { %v1899_v49 = vpop.eup %1898  ;;  %1579 = vmatpush.msra.mxu2 %v1550_v47 }
 0xbcf   :  { %v1370_v50 = vmul.f32 %v1899_v49, %v1349_v51  ;;  %v1549_v49 = vld [vmem:[#allocation10 + $0x18] sm:$0xff] }
 0xbd0   :  { %1580 = vmatpush.msra.mxu2 %v1549_v49 }
 0xbd1   :  { %1375 = vrot.lane.b32.xlu0 %v1370_v50, %s2077_s2 }
 0xc23   :  { %v1374_v53 = vpop.permute.xlu2 %1373 }
 0xc24   :  { %1379 = vst.msk [vmem:[#allocation2] sm:$0xff] %vm86_vm0, %v1374_v53  ;;  %1678 = vmatmul.msk.f32.vlgmr.msra.gmra.mxu0 %vm86_vm0, %v1374_v53  ;;  %1680 = vmatmul.msk.f32.vlgmr.msra.gmra.mxu1 %vm86_vm0, %v1374_v53 }
 0xc43   :  { %v1376_v54 = vpop.permute.xlu0 %1375 }
 0xc44   :  { %1380 = vst.msk [vmem:[#allocation2 + $0x8] sm:$0xff] %vm86_vm0, %v1376_v54  ;;  %1679 = vmatmul.msk.f32.vlgmr.msra.gmra.mxu3 %vm86_vm0, %v1376_v54  ;;  %1681 = vmatmul.msk.f32.gmra.mxu1 %vm86_vm0, %v1376_v54  ;;  %v1548_v54 = vld [vmem:[#allocation10 + $0x10] sm:$0xff] }
 0xc45   :  { %1581 = vmatpush.msra.mxu2 %v1548_v54 }
 0xca1   :  { %v1421_v57 = vpop.f32.mrf.mxu0  ;;  %v1444_v63 = vpop.f32.mrf.mxu1 }
 0xca2   :  { %v1422_v58 = vadd.f32 %v1421_v57, %v1396_v0  ;;  %v1445_v18 = vadd.f32 %v1444_v63, %v1397_v62 }
 0xca4   :  { %v1682_v59 = vmul.f32 -1.442695, %v1422_v58  ;;  %v1683_v19 = vmul.f32 -1.442695, %v1445_v18  ;;  %v1547_v58 = vld [vmem:[#allocation10 + $0x8] sm:$0xff] }
 0xca5   :  { %1582 = vmatpush.msra.mxu2 %v1547_v58 }
 0xca6   :  { %1900 = vpow2.f32 %v1682_v59 }
 0xcac   :  { %v1901_v60 = vpop.eup %1900 }
 0xcad   :  { %v1462_v10 = vadd.f32 1.0, %v1901_v60 }
 0xcaf   :  { %1902 = vrcp.f32 %v1462_v10  ;;  %v1477_v26 = vand.u32 2147483648, %v1462_v10  ;;  %v1475_v31 = vand.u32 2147483647, %v1462_v10  ;;  %vm1471_vm10 = vweird.f32 %v1462_v10 }
 0xcb0   :  { %1904 = vtanh.f32 %v1445_v18 }
 0xcb1   :  { %v1478_v45 = vor.u32 1.1754944e-38, %v1477_v26  ;;  %vm1476_vm12 = vcmp.eq.f32.partialorder %v1475_v31, 8.507059e+37 }
 0xcb5   :  { %v1903_v11 = vpop.eup %1902 }
 0xcb6   :  { %v1467_v20 = vmul.f32 %v1903_v11, %v1462_v10  ;;  %vm1472_vm9 = vweird.f32 %v1903_v11  ;;  %v1905_v42 = vpop.eup %1904 }
 0xcb7   :  { %vm1473_vm11 = vmor %vm1471_vm10, %vm1472_vm9 }
 0xcb8   :  { %v1468_v27 = vsub.f32 1.0, %v1467_v20 }
 0xcba   :  { %v1469_v21 = vmul.f32 %v1903_v11, %v1468_v27 }
 0xcbc   :  { %v1470_v22 = vadd.f32 %v1903_v11, %v1469_v21 }
 0xcbe   :  { %v1474_v33 = vsel %vm1473_vm11, %v1903_v11, %v1470_v22 }
 0xcbf   :  { %v1479_v36 = vsel %vm1476_vm12, %v1478_v45, %v1474_v33 }
 0xcc0   :  { %v1530_v24 = vmul.f32 %v1905_v42, %v1479_v36  ;;  %v1528_v48 = vmul.f32 %v1479_v36, %v2439_v17 }
 0xcc1   :  { %v1447_v1 = vpop.f32.mrf.mxu1 }
 0xcc2   :  { %1534 = vrot.lane.b32.xlu1 %v1530_v24, %s2077_s2  ;;  %v1448_v7 = vadd.f32 %v1447_v1, %v1397_v62 }
 0xcc4   :  { %v1685_v30 = vmul.f32 -1.442695, %v1448_v7 }
 0xcc7   :  { %v1424_v38 = vpop.f32.mrf.mxu3 }
 0xcc8   :  { %v1425_v56 = vadd.f32 %v1424_v38, %v1396_v0 }
 0xcca   :  { %v1684_v25 = vmul.f32 -1.442695, %v1425_v56 }
 0xccc   :  { %1906 = vpow2.f32 %v1684_v25 }
 0xcd2   :  { %v1907_v40 = vpop.eup %1906 }
 0xcd3   :  { %v1464_v52 = vadd.f32 1.0, %v1907_v40 }
 0xcd5   :  { %1908 = vrcp.f32 %v1464_v52  ;;  %v1507_v5 = vand.u32 2147483648, %v1464_v52  ;;  %v1505_v8 = vand.u32 2147483647, %v1464_v52  ;;  %vm1501_vm14 = vweird.f32 %v1464_v52 }
 0xcd6   :  { %1910 = vtanh.f32 %v1448_v7 }
 0xcd7   :  { %v1508_v13 = vor.u32 1.1754944e-38, %v1507_v5  ;;  %vm1506_vm1 = vcmp.eq.f32.partialorder %v1505_v8, 8.507059e+37  ;;  %1912 = vpow2.f32 %v1683_v19 }
 0xcdb   :  { %v1909_v2 = vpop.eup %1908 }
 0xcdc   :  { %v1497_v3 = vmul.f32 %v1909_v2, %v1464_v52  ;;  %vm1502_vm13 = vweird.f32 %v1909_v2  ;;  %v1911_v15 = vpop.eup %1910 }
 0xcdd   :  { %vm1503_vm15 = vmor %vm1501_vm14, %vm1502_vm13  ;;  %v1913_v28 = vpop.eup %1912 }
 0xcde   :  { %v1498_v4 = vsub.f32 1.0, %v1497_v3  ;;  %v1463_v29 = vadd.f32 1.0, %v1913_v28 }
 0xce0   :  { %v1499_v6 = vmul.f32 %v1909_v2, %v1498_v4  ;;  %1914 = vrcp.f32 %v1463_v29  ;;  %v1492_v55 = vand.u32 2147483648, %v1463_v29  ;;  %vm1486_vm3 = vweird.f32 %v1463_v29 }
 0xce1   :  { %1916 = vpow2.f32 %v1685_v30  ;;  %v1490_v0 = vand.u32 2147483647, %v1463_v29 }
 0xce2   :  { %v1500_v9 = vadd.f32 %v1909_v2, %v1499_v6  ;;  %v1493_v60 = vor.u32 1.1754944e-38, %v1492_v55 }
 0xce3   :  { %vm1491_vm5 = vcmp.eq.f32.partialorder %v1490_v0, 8.507059e+37 }
 0xce4   :  { %v1504_v14 = vsel %vm1503_vm15, %v1909_v2, %v1500_v9 }
 0xce5   :  { %v1509_v16 = vsel %vm1506_vm1, %v1508_v13, %v1504_v14 }
 0xce6   :  { %v1531_v61 = vmul.f32 %v1911_v15, %v1509_v16  ;;  %v1915_v32 = vpop.eup %1914  ;;  %v1529_v20 = vmul.f32 %v1509_v16, %v2443_v39 }
 0xce7   :  { %v1917_v34 = vpop.eup %1916  ;;  %v1482_v35 = vmul.f32 %v1915_v32, %v1463_v29  ;;  %vm1487_vm2 = vweird.f32 %v1915_v32 }
 0xce8   :  { %1536 = vrot.lane.b32.xlu2 %v1531_v61, %s2077_s2  ;;  %v1465_v37 = vadd.f32 1.0, %v1917_v34  ;;  %vm1488_vm4 = vmor %vm1486_vm3, %vm1487_vm2 }
 0xce9   :  { %v1483_v23 = vsub.f32 1.0, %v1482_v35 }
 0xcea   :  { %1918 = vrcp.f32 %v1465_v37  ;;  %v1522_v31 = vand.u32 2147483648, %v1465_v37  ;;  %vm1516_vm7 = vweird.f32 %v1465_v37  ;;  %v1520_v22 = vand.u32 2147483647, %v1465_v37 }
 0xceb   :  { %v1484_v46 = vmul.f32 %v1915_v32, %v1483_v23 }
 0xcec   :  { %v1523_v33 = vor.u32 1.1754944e-38, %v1522_v31  ;;  %vm1521_vm9 = vcmp.eq.f32.partialorder %v1520_v22, 8.507059e+37 }
 0xced   :  { %v1485_v53 = vadd.f32 %v1915_v32, %v1484_v46 }
 0xcef   :  { %v1489_v59 = vsel %vm1488_vm4, %v1915_v32, %v1485_v53 }
 0xcf0   :  { %1383 = vrot.lane.b32.xlu2 %v2439_v17, %s2077_s2  ;;  %v1919_v51 = vpop.eup %1918  ;;  %v1546_v17 = vld [vmem:[#allocation10] sm:$0xff]  ;;  %v1494_v63 = vsel %vm1491_vm5, %v1493_v60, %v1489_v59 }
 0xcf1   :  { %v1512_v57 = vmul.f32 %v1919_v51, %v1465_v37  ;;  %1583 = vmatpush.msra.mxu2 %v1546_v17  ;;  %vm1517_vm6 = vweird.f32 %v1919_v51 }
 0xcf2   :  { %vm1518_vm8 = vmor %vm1516_vm7, %vm1517_vm6 }
 0xcf3   :  { %v1513_v10 = vsub.f32 1.0, %v1512_v57 }
 0xcf5   :  { %v1514_v18 = vmul.f32 %v1919_v51, %v1513_v10 }
 0xcf7   :  { %v1515_v21 = vadd.f32 %v1919_v51, %v1514_v18 }
 0xcf9   :  { %v1519_v45 = vsel %vm1518_vm8, %v1919_v51, %v1515_v21 }
 0xcfa   :  { %v1524_v24 = vsel %vm1521_vm9, %v1523_v33, %v1519_v45 }
 0xd34   :  { %v1535_v12 = vpop.permute.xlu1 %1534 }
 0xd35   :  { %v1540_v50 = vadd.f32 %v1535_v12, %v1528_v48 }
 0xd37   :  { %1920 = vtanh.f32 %v1540_v50 }
 0xd3d   :  { %v1921_v62 = vpop.eup %1920 }
 0xd3e   :  { %v1544_v11 = vmul.f32 %v1921_v62, %v1494_v63 }
 0xd40   :  { %1560 = vrot.lane.b32.xlu0 %v1544_v11, %s2077_s2 }
 0xd42   :  { %v1537_v27 = vpop.permute.xlu2 %1536 }
 0xd43   :  { %v1541_v26 = vadd.f32 %v1537_v27, %v1529_v20 }
 0xd45   :  { %1922 = vtanh.f32 %v1541_v26 }
 0xd48   :  { %1385 = vrot.lane.b32.xlu0 %v2443_v39, %s2077_s2  ;;  %v1707_v39 = vld [vmem:[%s2481_s4] ss:$0 sm:$0xff] }
 0xd4a   :  { %v1384_v42 = vpop.permute.xlu2 %1383 }
 0xd4b   :  { %v1923_v36 = vpop.eup %1922  ;;  %1389 = vst.msk [vmem:[#allocation3] sm:$0xff] %vm86_vm0, %v1384_v42 }
 0xd4c   :  { %v1545_v38 = vmul.f32 %v1923_v36, %v1524_v24 }
 0xd4e   :  { %1562 = vrot.lane.b32.xlu1 %v1545_v38, %s2077_s2 }
 0xdb2   :  { %v1561_v56 = vpop.permute.xlu0 %1560 }
 0xdb3   :  { %1686 = vmatmul.msk.f32.vlgmr.msra.gmra.mxu2 %vm86_vm0, %v1561_v56 }
 0xdba   :  { %v1386_v25 = vpop.permute.xlu0 %1385 }
 0xdbb   :  { %1390 = vst.msk [vmem:[#allocation3 + $0x8] sm:$0xff] %vm86_vm0, %v1386_v25 }
 0xdc0   :  { %v1563_v40 = vpop.permute.xlu1 %1562 }
 0xdc1   :  { %1687 = vmatmul.msk.f32.gmra.mxu2 %vm86_vm0, %v1563_v40 }
 0xe36   :  { %v1585_v52 = vpop.f32.mrf.mxu2 }
 0xe37   :  { %v1586_v1 = vadd.f32 %v1707_v39, %v1585_v52 }
 0xe39   :  { %1591 = vst [vmem:[#allocation12] sm:$0xff] %v1586_v1 }
 0xe44   :  { %v1588_v2 = vpop.f32.mrf.mxu2 }
 0xe45   :  { %v1589_v7 = vadd.f32 %v1707_v39, %v1588_v2 }
 0xe47   :  { %1592 = vst [vmem:[#allocation12 + $0x8] sm:$0xff] %v1589_v7 }
 0xe48   :  { %1605 = dma.vmem_to_hbm [thread:$0]  %s1598_s17, 256, %s1600_s20, [#allocation6], %s2074_s13, %s2074_s13, %s2075_s14  }
 0xe49   :  { %2066 = dma.done.wait [#allocation6], 256  }
 0xe4a   :  { %2067 = vsyncadd [#allocation6], 4294967040 }
 0xe4b   :  { %1610 = vsyncpa [#allocation5], 1 }
 0xe4c   :  { %1611 = vsyncpa [#allocation8], 1 }
 0xe4d   :  { %1612 = vsyncpa [#allocation11], 1 }
 0xe4e   :  { %1613 = vsyncpa [#allocation6], 1 }

</bundles_post_ra>
